<compile_context>
chip_gen: v7x
topology: tpu7x:2x2x1
jax: 0.10.0
libtpu: 0.0.40
codegen_flags: <defaults>
</compile_context>

<pallas_src>
import numpy as np
import jax
import jax.numpy as jnp
from jax.experimental import pallas as pl
from jax.experimental.pallas import tpu as pltpu


def bigru_kernel(maxlen_ref,                    # (nb,) int32 SMEM (scalar prefetch)
                 len_ref,                       # (B_tile, 1) int32
                 x_ref,                         # (T_out, B_tile, Dw) matmul dtype
                 wih_f, whh_f, bgi_f, bhn_f,    # forward GRU params
                 wih_b, whh_b, bgi_b, bhn_b,    # backward GRU params
                 out_ref,                       # (T_out, B_tile, H) f32
                 gi_f_sc, gi_b_sc,              # (T_out, B_tile, 3H) scratch
                 acc_b_sc,                      # (T_out, B_tile, H) f32 scratch
                 hf_sc, hb_sc):                 # (B_tile, H) f32 scratch (hidden states)
    T_out, B_tile, Dw = x_ref.shape
    H = whh_f.shape[0]                          # whh: (H, 3H)
    tile_max = maxlen_ref[pl.program_id(0)]     # per-tile max valid length (dynamic)

    # ---- input projection hoisted out of the recurrence: one big matmul / dir ----
    x2 = x_ref[...].reshape(T_out * B_tile, Dw)          # already in matmul dtype
    gi_f_sc[...] = (jnp.dot(x2, wih_f[...], preferred_element_type=jnp.float32)
                    + bgi_f[...]).reshape(T_out, B_tile, 3 * H).astype(gi_f_sc.dtype)
    gi_b_sc[...] = (jnp.dot(x2, wih_b[...], preferred_element_type=jnp.float32)
                    + bgi_b[...]).reshape(T_out, B_tile, 3 * H).astype(gi_b_sc.dtype)

    # Zero-init: the dynamic loop only writes steps t < tile_max; everything else
    # stays zero (matches pad_packed_sequence zero padding).
    out_ref[...] = jnp.zeros_like(out_ref)
    acc_b_sc[...] = jnp.zeros_like(acc_b_sc)
    hf_sc[...] = jnp.zeros_like(hf_sc)
    hb_sc[...] = jnp.zeros_like(hb_sc)

    lens = len_ref[...]                         # (B_tile, 1) int32
    whh_f_v = whh_f[...]
    whh_b_v = whh_b[...]
    bhn_f_v = bhn_f[...]                        # (1, H)
    bhn_b_v = bhn_b[...]

    def gru_step(gi, gh, h, bhn):
        # gi already contains b_ih (all gates) + b_hh (r, z gates); math in f32.
        r = jax.nn.sigmoid(gi[:, :H] + gh[:, :H])
        z = jax.nn.sigmoid(gi[:, H:2 * H] + gh[:, H:2 * H])
        n = jnp.tanh(gi[:, 2 * H:] + r * (gh[:, 2 * H:] + bhn))
        return (1.0 - z) * n + z * h

    # ---- fused fwd/bwd recurrence, bounded by the per-tile max length ----
    @pl.loop(0, tile_max)
    def _(i):
        t_b = tile_max - 1 - i

        # forward direction at t = i (masked past each row's length)
        h_f = hf_sc[...]
        gh_f = jnp.dot(h_f.astype(whh_f_v.dtype), whh_f_v,
                       preferred_element_type=jnp.float32)
        hf_new = gru_step(gi_f_sc[i].astype(jnp.float32), gh_f, h_f, bhn_f_v)
        v_f = i < lens                          # (B_tile, 1) bool
        out_ref[i] = jnp.where(v_f, hf_new, 0.0)      # fwd half goes straight to out
        hf_sc[...] = jnp.where(v_f, hf_new, h_f)

        # backward direction at t = tile_max-1-i; packed semantics => state stays
        # zero until t == L-1, so the masked update reproduces pack/pad exactly.
        h_b = hb_sc[...]
        gh_b = jnp.dot(h_b.astype(whh_b_v.dtype), whh_b_v,
                       preferred_element_type=jnp.float32)
        hb_new = gru_step(gi_b_sc[t_b].astype(jnp.float32), gh_b, h_b, bhn_b_v)
        v_b = t_b < lens
        acc_b_sc[t_b] = jnp.where(v_b, hb_new, 0.0)
        hb_sc[...] = jnp.where(v_b, hb_new, h_b)

    # ---- single bulk, lane-dense combine; fwd/bwd halves averaged ----
    out_ref[...] = 0.5 * (out_ref[...] + acc_b_sc[...])


def _auto_b_tile(B, target):
    """Largest multiple-of-8 divisor of B that is <= target; prefer >= 2 grid tiles."""
    assert B % 8 == 0, "batch must be a multiple of 8 (sublane tile)"
    divisors = [d for d in range(8, min(target, B) + 1, 8) if B % d == 0]
    bt = max(divisors)
    if B // bt < 2:                              # leave work for both v7x TensorCores
        smaller = [d for d in divisors if B // d >= 2]
        if smaller:
            bt = max(smaller)
    return bt


def bigru_forward(tokens, lengths_list, params, *,
                  matmul_dtype=jnp.bfloat16,     # bf16 MXU operands by default
                  gi_dtype=jnp.float32,          # bf16 recommended on v7x (64 MiB VMEM)
                  b_tile=None,
                  mxu_m_target=128):             # 128 on v5e; up to 256 on v6e/v7x
    """tokens: (B, T) int32; lengths_list: python list of ints (static)."""
    emb = params["embed"]
    B, T = tokens.shape
    Dw = emb.shape[1]
    H = params["whh_f"].shape[0]
    assert H % 128 == 0, "hidden size must be a multiple of 128 lanes"
    T_out = int(max(lengths_list))               # pad_packed_sequence trims to max length

    if b_tile is None:
        b_tile = _auto_b_tile(B, mxu_m_target)
    assert B % b_tile == 0 and b_tile % 8 == 0
    nb = B // b_tile

    # Sort the batch by length (descending) so per-tile max lengths shrink; the
    # output is un-permuted at the end (pack_padded_sequence(enforce_sorted=False)).
    lengths_np = np.asarray(lengths_list, np.int32)
    order = np.argsort(-lengths_np, kind="stable")
    inv_order = np.argsort(order)
    tokens_s = jnp.take(tokens, jnp.asarray(order, dtype=jnp.int32), axis=0)
    lengths_s = lengths_np[order]
    tile_max = np.asarray(
        [int(lengths_s[b * b_tile:(b + 1) * b_tile].max()) for b in range(nb)],
        np.int32)

    # glue: embedding lookup + (eval-mode) dropout; pad Dw to a 128-lane multiple
    x_embed = jnp.take(emb, tokens_s, axis=0).astype(jnp.float32)     # (B, T, Dw)
    Dw_pad = ((Dw + 127) // 128) * 128
    wih_f = params["wih_f"]
    wih_b = params["wih_b"]
    if Dw_pad != Dw:
        # zero-fill padded x lanes AND the matching wih rows -> padded K contributes 0
        x_embed = jnp.pad(x_embed, ((0, 0), (0, 0), (0, Dw_pad - Dw)))
        wih_f = jnp.pad(wih_f, ((0, Dw_pad - Dw), (0, 0)))
        wih_b = jnp.pad(wih_b, ((0, Dw_pad - Dw), (0, 0)))

    # bf16 cast happens upstream: halves the big x-block DMA and the weight DMAs.
    x_tm = jnp.transpose(x_embed, (1, 0, 2))[:T_out].astype(matmul_dtype)  # (T_out,B,Dw_pad)
    lengths = jnp.asarray(lengths_s, dtype=jnp.int32).reshape(B, 1)

    def fold(bih, bhh):
        # fold b_ih + b_hh(r,z) into the precomputed input projection;
        # keep b_hh_n separate (it is multiplied by r inside the cell).
        bgi = bih + jnp.concatenate(
            [bhh[:, :2 * H], jnp.zeros((1, H), jnp.float32)], axis=1)
        return bgi, bhh[:, 2 * H:]

    bgi_f, bhn_f = fold(params["bih_f"], params["bhh_f"])
    bgi_b, bhn_b = fold(params["bih_b"], params["bhh_b"])

    wih_f = wih_f.astype(matmul_dtype)
    whh_f = params["whh_f"].astype(matmul_dtype)
    wih_b = wih_b.astype(matmul_dtype)
    whh_b = params["whh_b"].astype(matmul_dtype)

    # ---- explicit VMEM budget: double-buffered IO blocks + weights + scratch ----
    mm_bytes = jnp.dtype(matmul_dtype).itemsize
    gi_bytes = jnp.dtype(gi_dtype).itemsize
    weight_bytes = 2 * (Dw_pad * 3 * H + H * 3 * H) * mm_bytes + 2 * (3 * H + H) * 4
    io_bytes = 2 * (T_out * b_tile * Dw_pad * mm_bytes       # x block
                    + T_out * b_tile * H * 4                 # out block
                    + b_tile * 4) + 2 * weight_bytes         # lengths + weights (dbl-buf)
    scratch_bytes = (2 * T_out * b_tile * 3 * H * gi_bytes   # gi_f / gi_b
                     + T_out * b_tile * H * 4                # acc_b
                     + 2 * b_tile * H * 4)                   # h_f / h_b
    vmem_limit = int(min(max(1.3 * (io_bytes + scratch_bytes) + (2 << 20), 8 << 20),
                         64 << 20))                          # cap at v7x physical VMEM

    const = lambda b, ml: (0, 0)
    grid_spec = pltpu.PrefetchScalarGridSpec(
        num_scalar_prefetch=1,                                # per-tile max lengths (SMEM)
        grid=(nb,),
        in_specs=[
            pl.BlockSpec((b_tile, 1), lambda b, ml: (b, 0)),              # lengths
            pl.BlockSpec((T_out, b_tile, Dw_pad), lambda b, ml: (0, b, 0)),  # x (time-major)
            pl.BlockSpec((Dw_pad, 3 * H), const),                         # wih_f
            pl.BlockSpec((H, 3 * H), const),                              # whh_f
            pl.BlockSpec((1, 3 * H), const),                              # bgi_f
            pl.BlockSpec((1, H), const),                                  # bhn_f
            pl.BlockSpec((Dw_pad, 3 * H), const),                         # wih_b
            pl.BlockSpec((H, 3 * H), const),                              # whh_b
            pl.BlockSpec((1, 3 * H), const),                              # bgi_b
            pl.BlockSpec((1, H), const),                                  # bhn_b
        ],
        out_specs=pl.BlockSpec((T_out, b_tile, H), lambda b, ml: (0, b, 0)),
        scratch_shapes=[
            pltpu.VMEM((T_out, b_tile, 3 * H), gi_dtype),    # gi_f
            pltpu.VMEM((T_out, b_tile, 3 * H), gi_dtype),    # gi_b
            pltpu.VMEM((T_out, b_tile, H), jnp.float32),     # acc_b (fwd half lives in out_ref)
            pltpu.VMEM((b_tile, H), jnp.float32),            # h_f
            pltpu.VMEM((b_tile, H), jnp.float32),            # h_b
        ],
    )

    out_tm = pl.pallas_call(
        bigru_kernel,
        out_shape=jax.ShapeDtypeStruct((T_out, B, H), jnp.float32),
        grid_spec=grid_spec,
        compiler_params=pltpu.CompilerParams(
            dimension_semantics=("parallel",),    # batch tiles independent (v7x: 2 TCs)
            vmem_limit_bytes=vmem_limit),
    )(jnp.asarray(tile_max), lengths, x_tm,
      wih_f, whh_f, bgi_f, bhn_f,
      wih_b, whh_b, bgi_b, bhn_b)

    out_bt = jnp.transpose(out_tm, (1, 0, 2))                       # (B_sorted, T_out, H)
    return jnp.take(out_bt, jnp.asarray(inv_order, dtype=jnp.int32), axis=0)


def make_params(key, vocab_size, word_dim, hidden):
    ks = jax.random.split(key, 10)
    k = 1.0 / np.sqrt(hidden)
    u = lambda kk, shape: jax.random.uniform(kk, shape, jnp.float32, -k, k)
    return {
        "embed": jax.random.normal(ks[0], (vocab_size, word_dim), jnp.float32),
        # stored transposed for right-multiplication: (in_dim, 3H)
        "wih_f": u(ks[1], (word_dim, 3 * hidden)),
        "whh_f": u(ks[2], (hidden, 3 * hidden)),
        "bih_f": u(ks[3], (1, 3 * hidden)),
        "bhh_f": u(ks[4], (1, 3 * hidden)),
        "wih_b": u(ks[5], (word_dim, 3 * hidden)),
        "whh_b": u(ks[6], (hidden, 3 * hidden)),
        "bih_b": u(ks[7], (1, 3 * hidden)),
        "bhh_b": u(ks[8], (1, 3 * hidden)),
    }


def ref_forward(x_embed, lengths_list, params, T_out):
    """Pure numpy reference reproducing pack_padded_sequence + bi-GRU + pad_packed."""
    x = np.asarray(x_embed, np.float32)
    B, T, Dw = x.shape
    H = params["whh_f"].shape[0]
    p = {k: np.asarray(v, np.float32) for k, v in params.items()}
    out = np.zeros((B, T_out, H), np.float32)

    def cell(xt, h, wih, whh, bih, bhh):
        gi = xt @ wih + bih[0]
        gh = h @ whh + bhh[0]
        r = 1.0 / (1.0 + np.exp(-(gi[:H] + gh[:H])))
        z = 1.0 / (1.0 + np.exp(-(gi[H:2 * H] + gh[H:2 * H])))
        n = np.tanh(gi[2 * H:] + r * gh[2 * H:])
        return (1.0 - z) * n + z * h

    for b in range(B):
        L = int(lengths_list[b])
        h = np.zeros(H, np.float32)
        for t in range(L):
            h = cell(x[b, t], h, p["wih_f"], p["whh_f"], p["bih_f"], p["bhh_f"])
            out[b, t] += 0.5 * h
        h = np.zeros(H, np.float32)
        for t in range(L - 1, -1, -1):
            h = cell(x[b, t], h, p["wih_b"], p["whh_b"], p["bih_b"], p["bhh_b"])
            out[b, t] += 0.5 * h
    return out


if __name__ == "__main__":
    VOCAB = 8590       # fixed in the module
    WORD_DIM = 120     # small stand-in for word_dim=300; wrapper pads K to 128
    HIDDEN = 128       # small, lane-aligned stand-in for embed_dim=512
    B, T = 16, 10      # 2 batch tiles of 8 -> exercises the parallel grid axis
    lengths_list = [10, 4, 9, 3, 8, 5, 7, 2, 9, 6, 5, 3, 7, 2, 6, 4]   # T_out = 10

    key = jax.random.PRNGKey(0)
    kp, kt = jax.random.split(key)
    params = make_params(kp, VOCAB, WORD_DIM, HIDDEN)
    tokens = jax.random.randint(kt, (B, T), 0, VOCAB, dtype=jnp.int32)

    x_embed = jnp.take(params["embed"], tokens, axis=0)
    ref = ref_forward(np.asarray(x_embed), lengths_list, params, int(max(lengths_list)))

    # f32 MXU path (exact check against the numpy reference)
    out_f32 = bigru_forward(tokens, lengths_list, params, matmul_dtype=jnp.float32)
    out_f32 = jax.block_until_ready(out_f32)
    np.testing.assert_allclose(np.asarray(out_f32), ref, atol=1e-4, rtol=1e-4)

    # default path: bf16 MXU operands (upstream cast) + bf16 gi scratch (v6e/v7x);
    # gate math stays f32 -> loose tolerance check
    out_bf16 = bigru_forward(tokens, lengths_list, params, gi_dtype=jnp.bfloat16)
    out_bf16 = jax.block_until_ready(out_bf16)
    np.testing.assert_allclose(np.asarray(out_bf16), ref, atol=1e-1, rtol=1e-1)

    print("KERNEL_OK")
</pallas_src>

<mosaic_0001>
module attributes {stable_mosaic.version = 11 : i64} {
  func.func @bigru_kernel(%arg0: i32, %arg1: memref<2xi32, #tpu.memory_space<smem>>, %arg2: memref<8x1xi32, #tpu.memory_space<vmem>>, %arg3: memref<10x8x128xf32, #tpu.memory_space<vmem>>, %arg4: memref<128x384xf32, #tpu.memory_space<vmem>>, %arg5: memref<128x384xf32, #tpu.memory_space<vmem>>, %arg6: memref<1x384xf32, #tpu.memory_space<vmem>>, %arg7: memref<1x128xf32, #tpu.memory_space<vmem>>, %arg8: memref<128x384xf32, #tpu.memory_space<vmem>>, %arg9: memref<128x384xf32, #tpu.memory_space<vmem>>, %arg10: memref<1x384xf32, #tpu.memory_space<vmem>>, %arg11: memref<1x128xf32, #tpu.memory_space<vmem>>, %arg12: memref<10x8x128xf32, #tpu.memory_space<vmem>>, %arg13: memref<10x8x384xf32, #tpu.memory_space<vmem>>, %arg14: memref<10x8x384xf32, #tpu.memory_space<vmem>>, %arg15: memref<10x8x128xf32, #tpu.memory_space<vmem>>, %arg16: memref<8x128xf32, #tpu.memory_space<vmem>>, %arg17: memref<8x128xf32, #tpu.memory_space<vmem>>) attributes {dimension_semantics = [#tpu.dimension_semantics<parallel>], iteration_bounds = array<i64: 2>, scalar_prefetch = 1 : i64, scratch_operands = 5 : i64, tpu.core_type = #tpu.core_type<tc>, window_params = [{transform_indices = @transform_0, window_bounds = array<i64: 8, 1>}, {transform_indices = @transform_1, window_bounds = array<i64: 10, 8, 128>}, {pipeline_mode = #tpu.pipeline_mode<synchronous>, transform_indices = @transform_2, window_bounds = array<i64: 128, 384>}, {pipeline_mode = #tpu.pipeline_mode<synchronous>, transform_indices = @transform_3, window_bounds = array<i64: 128, 384>}, {pipeline_mode = #tpu.pipeline_mode<synchronous>, transform_indices = @transform_4, window_bounds = array<i64: 1, 384>}, {pipeline_mode = #tpu.pipeline_mode<synchronous>, transform_indices = @transform_5, window_bounds = array<i64: 1, 128>}, {pipeline_mode = #tpu.pipeline_mode<synchronous>, transform_indices = @transform_6, window_bounds = array<i64: 128, 384>}, {pipeline_mode = #tpu.pipeline_mode<synchronous>, transform_indices = @transform_7, window_bounds = array<i64: 128, 384>}, {pipeline_mode = #tpu.pipeline_mode<synchronous>, transform_indices = @transform_8, window_bounds = array<i64: 1, 384>}, {pipeline_mode = #tpu.pipeline_mode<synchronous>, transform_indices = @transform_9, window_bounds = array<i64: 1, 128>}, {transform_indices = @transform_10, window_bounds = array<i64: 10, 8, 128>}]} {
    %0 = arith.index_cast %arg0 : i32 to index
    %1 = memref.load %arg1[%0] : memref<2xi32, #tpu.memory_space<smem>>
    %c0 = arith.constant 0 : index
    %c0_0 = arith.constant 0 : index
    %c0_1 = arith.constant 0 : index
    %2 = vector.load %arg3[%c0, %c0_0, %c0_1] : memref<10x8x128xf32, #tpu.memory_space<vmem>>, vector<10x8x128xf32>
    %3 = vector.shape_cast %2 : vector<10x8x128xf32> to vector<80x128xf32>
    %c0_2 = arith.constant 0 : index
    %c0_3 = arith.constant 0 : index
    %4 = vector.load %arg4[%c0_2, %c0_3] : memref<128x384xf32, #tpu.memory_space<vmem>>, vector<128x384xf32>
    %cst = arith.constant dense<0.000000e+00> : vector<80x384xf32>
    %5 = tpu.matmul %3, %4, %cst {dimension_numbers = #tpu.dot_dimension_numbers<[1], [0], [0], [1], [0, 0, 1, 1], [], []>} : vector<80x128xf32>, vector<128x384xf32>, vector<80x384xf32> -> vector<80x384xf32>
    %c0_4 = arith.constant 0 : index
    %c0_5 = arith.constant 0 : index
    %6 = vector.load %arg6[%c0_4, %c0_5] : memref<1x384xf32, #tpu.memory_space<vmem>>, vector<1x384xf32>
    %7 = vector.broadcast %6 : vector<1x384xf32> to vector<80x384xf32>
    %8 = arith.addf %5, %7 : vector<80x384xf32>
    %9 = vector.shape_cast %8 : vector<80x384xf32> to vector<10x8x384xf32>
    %c0_6 = arith.constant 0 : index
    %c0_7 = arith.constant 0 : index
    %c0_8 = arith.constant 0 : index
    %10 = vector.load %arg13[%c0_6, %c0_7, %c0_8] : memref<10x8x384xf32, #tpu.memory_space<vmem>>, vector<10x8x384xf32>
    tpu.vector_store %arg13[%c0_6, %c0_7, %c0_8], %9 {strides = array<i32>} : memref<10x8x384xf32, #tpu.memory_space<vmem>>, vector<10x8x384xf32>,
    %c0_9 = arith.constant 0 : index
    %c0_10 = arith.constant 0 : index
    %11 = vector.load %arg8[%c0_9, %c0_10] : memref<128x384xf32, #tpu.memory_space<vmem>>, vector<128x384xf32>
    %cst_11 = arith.constant dense<0.000000e+00> : vector<80x384xf32>
    %12 = tpu.matmul %3, %11, %cst_11 {dimension_numbers = #tpu.dot_dimension_numbers<[1], [0], [0], [1], [0, 0, 1, 1], [], []>} : vector<80x128xf32>, vector<128x384xf32>, vector<80x384xf32> -> vector<80x384xf32>
    %c0_12 = arith.constant 0 : index
    %c0_13 = arith.constant 0 : index
    %13 = vector.load %arg10[%c0_12, %c0_13] : memref<1x384xf32, #tpu.memory_space<vmem>>, vector<1x384xf32>
    %14 = vector.broadcast %13 : vector<1x384xf32> to vector<80x384xf32>
    %15 = arith.addf %12, %14 : vector<80x384xf32>
    %16 = vector.shape_cast %15 : vector<80x384xf32> to vector<10x8x384xf32>
    %c0_14 = arith.constant 0 : index
    %c0_15 = arith.constant 0 : index
    %c0_16 = arith.constant 0 : index
    %17 = vector.load %arg14[%c0_14, %c0_15, %c0_16] : memref<10x8x384xf32, #tpu.memory_space<vmem>>, vector<10x8x384xf32>
    tpu.vector_store %arg14[%c0_14, %c0_15, %c0_16], %16 {strides = array<i32>} : memref<10x8x384xf32, #tpu.memory_space<vmem>>, vector<10x8x384xf32>,
    %cst_17 = arith.constant 0.000000e+00 : f32
    %18 = vector.broadcast %cst_17 : f32 to vector<10x8x128xf32>
    %c0_18 = arith.constant 0 : index
    %c0_19 = arith.constant 0 : index
    %c0_20 = arith.constant 0 : index
    %19 = vector.load %arg12[%c0_18, %c0_19, %c0_20] : memref<10x8x128xf32, #tpu.memory_space<vmem>>, vector<10x8x128xf32>
    tpu.vector_store %arg12[%c0_18, %c0_19, %c0_20], %18 {strides = array<i32>} : memref<10x8x128xf32, #tpu.memory_space<vmem>>, vector<10x8x128xf32>,
    %cst_21 = arith.constant 0.000000e+00 : f32
    %20 = vector.broadcast %cst_21 : f32 to vector<10x8x128xf32>
    %c0_22 = arith.constant 0 : index
    %c0_23 = arith.constant 0 : index
    %c0_24 = arith.constant 0 : index
    %21 = vector.load %arg15[%c0_22, %c0_23, %c0_24] : memref<10x8x128xf32, #tpu.memory_space<vmem>>, vector<10x8x128xf32>
    tpu.vector_store %arg15[%c0_22, %c0_23, %c0_24], %20 {strides = array<i32>} : memref<10x8x128xf32, #tpu.memory_space<vmem>>, vector<10x8x128xf32>,
    %cst_25 = arith.constant 0.000000e+00 : f32
    %22 = vector.broadcast %cst_25 : f32 to vector<8x128xf32>
    %c0_26 = arith.constant 0 : index
    %c0_27 = arith.constant 0 : index
    %23 = vector.load %arg16[%c0_26, %c0_27] : memref<8x128xf32, #tpu.memory_space<vmem>>, vector<8x128xf32>
    tpu.vector_store %arg16[%c0_26, %c0_27], %22 {strides = array<i32>} : memref<8x128xf32, #tpu.memory_space<vmem>>, vector<8x128xf32>,
    %cst_28 = arith.constant 0.000000e+00 : f32
    %24 = vector.broadcast %cst_28 : f32 to vector<8x128xf32>
    %c0_29 = arith.constant 0 : index
    %c0_30 = arith.constant 0 : index
    %25 = vector.load %arg17[%c0_29, %c0_30] : memref<8x128xf32, #tpu.memory_space<vmem>>, vector<8x128xf32>
    tpu.vector_store %arg17[%c0_29, %c0_30], %24 {strides = array<i32>} : memref<8x128xf32, #tpu.memory_space<vmem>>, vector<8x128xf32>,
    %c0_31 = arith.constant 0 : index
    %c0_32 = arith.constant 0 : index
    %26 = vector.load %arg2[%c0_31, %c0_32] : memref<8x1xi32, #tpu.memory_space<vmem>>, vector<8x1xi32>
    %c0_33 = arith.constant 0 : index
    %c0_34 = arith.constant 0 : index
    %27 = vector.load %arg5[%c0_33, %c0_34] : memref<128x384xf32, #tpu.memory_space<vmem>>, vector<128x384xf32>
    %c0_35 = arith.constant 0 : index
    %c0_36 = arith.constant 0 : index
    %28 = vector.load %arg9[%c0_35, %c0_36] : memref<128x384xf32, #tpu.memory_space<vmem>>, vector<128x384xf32>
    %c0_37 = arith.constant 0 : index
    %c0_38 = arith.constant 0 : index
    %29 = vector.load %arg7[%c0_37, %c0_38] : memref<1x128xf32, #tpu.memory_space<vmem>>, vector<1x128xf32>
    %c0_39 = arith.constant 0 : index
    %c0_40 = arith.constant 0 : index
    %30 = vector.load %arg11[%c0_39, %c0_40] : memref<1x128xf32, #tpu.memory_space<vmem>>, vector<1x128xf32>
    %c0_i32 = arith.constant 0 : i32
    %31 = arith.subi %1, %c0_i32 : i32
    %c1_i32 = arith.constant 1 : i32
    %c1_i32_41 = arith.constant 1 : i32
    %32 = arith.subi %c1_i32, %c1_i32_41 : i32
    %33 = arith.addi %31, %32 : i32
    %c1_i32_42 = arith.constant 1 : i32
    %34 = arith.divsi %33, %c1_i32_42 : i32
    %c1_i32_43 = arith.constant 1 : i32
    %c0_i32_44 = arith.constant 0 : i32
    %c0_i32_45 = arith.constant 0 : i32
    %35 = arith.subi %34, %c0_i32_45 : i32
    %36 = arith.addi %c0_i32_45, %35 : i32
    %c1_i32_46 = arith.constant 1 : i32
    scf.for %arg18 = %c0_i32_45 to %36 step %c1_i32_46  : i32 {
      %43 = arith.muli %arg18, %c1_i32_43 : i32
      %44 = arith.addi %c0_i32_44, %43 : i32
      %c1_i32_57 = arith.constant 1 : i32
      %45 = arith.subi %1, %c1_i32_57 : i32
      %46 = arith.subi %45, %44 : i32
      %c0_58 = arith.constant 0 : index
      %c0_59 = arith.constant 0 : index
      %47 = vector.load %arg16[%c0_58, %c0_59] : memref<8x128xf32, #tpu.memory_space<vmem>>, vector<8x128xf32>
      %cst_60 = arith.constant dense<0.000000e+00> : vector<8x384xf32>
      %48 = tpu.matmul %47, %27, %cst_60 {dimension_numbers = #tpu.dot_dimension_numbers<[1], [0], [0], [1], [0, 0, 1, 1], [], []>} : vector<8x128xf32>, vector<128x384xf32>, vector<8x384xf32> -> vector<8x384xf32>
      %49 = arith.index_cast %44 : i32 to index
      %c0_61 = arith.constant 0 : index
      %c0_62 = arith.constant 0 : index
      %50 = vector.load %arg13[%49, %c0_61, %c0_62] : memref<10x8x384xf32, #tpu.memory_space<vmem>>, vector<1x8x384xf32>
      %51 = vector.shape_cast %50 : vector<1x8x384xf32> to vector<8x384xf32>
      %52 = vector.extract_strided_slice %51 {offsets = [0, 0], sizes = [8, 128], strides = [1, 1]} : vector<8x384xf32> to vector<8x128xf32>
      %53 = vector.extract_strided_slice %48 {offsets = [0, 0], sizes = [8, 128], strides = [1, 1]} : vector<8x384xf32> to vector<8x128xf32>
      %54 = arith.addf %52, %53 : vector<8x128xf32>
      %55 = arith.negf %54 : vector<8x128xf32>
      %56 = math.exp %55 : vector<8x128xf32>
      %cst_63 = arith.constant 1.000000e+00 : f32
      %57 = vector.broadcast %cst_63 : f32 to vector<8x128xf32>
      %58 = arith.addf %57, %56 : vector<8x128xf32>
      %59 = arith.divf %57, %58 : vector<8x128xf32>
      %60 = vector.extract_strided_slice %51 {offsets = [0, 128], sizes = [8, 128], strides = [1, 1]} : vector<8x384xf32> to vector<8x128xf32>
      %61 = vector.extract_strided_slice %48 {offsets = [0, 128], sizes = [8, 128], strides = [1, 1]} : vector<8x384xf32> to vector<8x128xf32>
      %62 = arith.addf %60, %61 : vector<8x128xf32>
      %63 = arith.negf %62 : vector<8x128xf32>
      %64 = math.exp %63 : vector<8x128xf32>
      %cst_64 = arith.constant 1.000000e+00 : f32
      %65 = vector.broadcast %cst_64 : f32 to vector<8x128xf32>
      %66 = arith.addf %65, %64 : vector<8x128xf32>
      %67 = arith.divf %65, %66 : vector<8x128xf32>
      %68 = vector.extract_strided_slice %51 {offsets = [0, 256], sizes = [8, 128], strides = [1, 1]} : vector<8x384xf32> to vector<8x128xf32>
      %69 = vector.extract_strided_slice %48 {offsets = [0, 256], sizes = [8, 128], strides = [1, 1]} : vector<8x384xf32> to vector<8x128xf32>
      %70 = vector.broadcast %29 : vector<1x128xf32> to vector<8x128xf32>
      %71 = arith.addf %69, %70 : vector<8x128xf32>
      %72 = arith.mulf %59, %71 : vector<8x128xf32>
      %73 = arith.addf %68, %72 : vector<8x128xf32>
      %74 = math.tanh %73 : vector<8x128xf32>
      %cst_65 = arith.constant 1.000000e+00 : f32
      %75 = vector.broadcast %cst_65 : f32 to vector<8x128xf32>
      %76 = arith.subf %75, %67 : vector<8x128xf32>
      %77 = arith.mulf %76, %74 : vector<8x128xf32>
      %78 = arith.mulf %67, %47 : vector<8x128xf32>
      %79 = arith.addf %77, %78 : vector<8x128xf32>
      %80 = vector.broadcast %44 : i32 to vector<8x1xi32>
      %81 = arith.cmpi slt, %80, %26 : vector<8x1xi32>
      %cst_66 = arith.constant 0.000000e+00 : f32
      %82 = vector.shape_cast %81 : vector<8x1xi1> to vector<8x1xi1>
      %83 = vector.broadcast %82 : vector<8x1xi1> to vector<8x128xi1>
      %84 = vector.broadcast %cst_66 : f32 to vector<8x128xf32>
      %85 = arith.select %83, %79, %84 : vector<8x128xi1>, vector<8x128xf32>
      %86 = arith.index_cast %44 : i32 to index
      %c0_67 = arith.constant 0 : index
      %c0_68 = arith.constant 0 : index
      %87 = vector.load %arg12[%86, %c0_67, %c0_68] : memref<10x8x128xf32, #tpu.memory_space<vmem>>, vector<1x8x128xf32>
      %88 = vector.shape_cast %87 : vector<1x8x128xf32> to vector<8x128xf32>
      %89 = vector.shape_cast %85 : vector<8x128xf32> to vector<1x8x128xf32>
      tpu.vector_store %arg12[%86, %c0_67, %c0_68], %89 {strides = array<i32>} : memref<10x8x128xf32, #tpu.memory_space<vmem>>, vector<1x8x128xf32>,
      %90 = vector.shape_cast %81 : vector<8x1xi1> to vector<8x1xi1>
      %91 = vector.broadcast %90 : vector<8x1xi1> to vector<8x128xi1>
      %92 = arith.select %91, %79, %47 : vector<8x128xi1>, vector<8x128xf32>
      %c0_69 = arith.constant 0 : index
      %c0_70 = arith.constant 0 : index
      %93 = vector.load %arg16[%c0_69, %c0_70] : memref<8x128xf32, #tpu.memory_space<vmem>>, vector<8x128xf32>
      tpu.vector_store %arg16[%c0_69, %c0_70], %92 {strides = array<i32>} : memref<8x128xf32, #tpu.memory_space<vmem>>, vector<8x128xf32>,
      %c0_71 = arith.constant 0 : index
      %c0_72 = arith.constant 0 : index
      %94 = vector.load %arg17[%c0_71, %c0_72] : memref<8x128xf32, #tpu.memory_space<vmem>>, vector<8x128xf32>
      %cst_73 = arith.constant dense<0.000000e+00> : vector<8x384xf32>
      %95 = tpu.matmul %94, %28, %cst_73 {dimension_numbers = #tpu.dot_dimension_numbers<[1], [0], [0], [1], [0, 0, 1, 1], [], []>} : vector<8x128xf32>, vector<128x384xf32>, vector<8x384xf32> -> vector<8x384xf32>
      %96 = arith.index_cast %46 : i32 to index
      %c0_74 = arith.constant 0 : index
      %c0_75 = arith.constant 0 : index
      %97 = vector.load %arg14[%96, %c0_74, %c0_75] : memref<10x8x384xf32, #tpu.memory_space<vmem>>, vector<1x8x384xf32>
      %98 = vector.shape_cast %97 : vector<1x8x384xf32> to vector<8x384xf32>
      %99 = vector.extract_strided_slice %98 {offsets = [0, 0], sizes = [8, 128], strides = [1, 1]} : vector<8x384xf32> to vector<8x128xf32>
      %100 = vector.extract_strided_slice %95 {offsets = [0, 0], sizes = [8, 128], strides = [1, 1]} : vector<8x384xf32> to vector<8x128xf32>
      %101 = arith.addf %99, %100 : vector<8x128xf32>
      %102 = arith.negf %101 : vector<8x128xf32>
      %103 = math.exp %102 : vector<8x128xf32>
      %cst_76 = arith.constant 1.000000e+00 : f32
      %104 = vector.broadcast %cst_76 : f32 to vector<8x128xf32>
      %105 = arith.addf %104, %103 : vector<8x128xf32>
      %106 = arith.divf %104, %105 : vector<8x128xf32>
      %107 = vector.extract_strided_slice %98 {offsets = [0, 128], sizes = [8, 128], strides = [1, 1]} : vector<8x384xf32> to vector<8x128xf32>
      %108 = vector.extract_strided_slice %95 {offsets = [0, 128], sizes = [8, 128], strides = [1, 1]} : vector<8x384xf32> to vector<8x128xf32>
      %109 = arith.addf %107, %108 : vector<8x128xf32>
      %110 = arith.negf %109 : vector<8x128xf32>
      %111 = math.exp %110 : vector<8x128xf32>
      %cst_77 = arith.constant 1.000000e+00 : f32
      %112 = vector.broadcast %cst_77 : f32 to vector<8x128xf32>
      %113 = arith.addf %112, %111 : vector<8x128xf32>
      %114 = arith.divf %112, %113 : vector<8x128xf32>
      %115 = vector.extract_strided_slice %98 {offsets = [0, 256], sizes = [8, 128], strides = [1, 1]} : vector<8x384xf32> to vector<8x128xf32>
      %116 = vector.extract_strided_slice %95 {offsets = [0, 256], sizes = [8, 128], strides = [1, 1]} : vector<8x384xf32> to vector<8x128xf32>
      %117 = vector.broadcast %30 : vector<1x128xf32> to vector<8x128xf32>
      %118 = arith.addf %116, %117 : vector<8x128xf32>
      %119 = arith.mulf %106, %118 : vector<8x128xf32>
      %120 = arith.addf %115, %119 : vector<8x128xf32>
      %121 = math.tanh %120 : vector<8x128xf32>
      %cst_78 = arith.constant 1.000000e+00 : f32
      %122 = vector.broadcast %cst_78 : f32 to vector<8x128xf32>
      %123 = arith.subf %122, %114 : vector<8x128xf32>
      %124 = arith.mulf %123, %121 : vector<8x128xf32>
      %125 = arith.mulf %114, %94 : vector<8x128xf32>
      %126 = arith.addf %124, %125 : vector<8x128xf32>
      %127 = vector.broadcast %46 : i32 to vector<8x1xi32>
      %128 = arith.cmpi slt, %127, %26 : vector<8x1xi32>
      %cst_79 = arith.constant 0.000000e+00 : f32
      %129 = vector.shape_cast %128 : vector<8x1xi1> to vector<8x1xi1>
      %130 = vector.broadcast %129 : vector<8x1xi1> to vector<8x128xi1>
      %131 = vector.broadcast %cst_79 : f32 to vector<8x128xf32>
      %132 = arith.select %130, %126, %131 : vector<8x128xi1>, vector<8x128xf32>
      %133 = arith.index_cast %46 : i32 to index
      %c0_80 = arith.constant 0 : index
      %c0_81 = arith.constant 0 : index
      %134 = vector.load %arg15[%133, %c0_80, %c0_81] : memref<10x8x128xf32, #tpu.memory_space<vmem>>, vector<1x8x128xf32>
      %135 = vector.shape_cast %134 : vector<1x8x128xf32> to vector<8x128xf32>
      %136 = vector.shape_cast %132 : vector<8x128xf32> to vector<1x8x128xf32>
      tpu.vector_store %arg15[%133, %c0_80, %c0_81], %136 {strides = array<i32>} : memref<10x8x128xf32, #tpu.memory_space<vmem>>, vector<1x8x128xf32>,
      %137 = vector.shape_cast %128 : vector<8x1xi1> to vector<8x1xi1>
      %138 = vector.broadcast %137 : vector<8x1xi1> to vector<8x128xi1>
      %139 = arith.select %138, %126, %94 : vector<8x128xi1>, vector<8x128xf32>
      %c0_82 = arith.constant 0 : index
      %c0_83 = arith.constant 0 : index
      %140 = vector.load %arg17[%c0_82, %c0_83] : memref<8x128xf32, #tpu.memory_space<vmem>>, vector<8x128xf32>
      tpu.vector_store %arg17[%c0_82, %c0_83], %139 {strides = array<i32>} : memref<8x128xf32, #tpu.memory_space<vmem>>, vector<8x128xf32>,
    }
    %c0_47 = arith.constant 0 : index
    %c0_48 = arith.constant 0 : index
    %c0_49 = arith.constant 0 : index
    %37 = vector.load %arg12[%c0_47, %c0_48, %c0_49] : memref<10x8x128xf32, #tpu.memory_space<vmem>>, vector<10x8x128xf32>
    %c0_50 = arith.constant 0 : index
    %c0_51 = arith.constant 0 : index
    %c0_52 = arith.constant 0 : index
    %38 = vector.load %arg15[%c0_50, %c0_51, %c0_52] : memref<10x8x128xf32, #tpu.memory_space<vmem>>, vector<10x8x128xf32>
    %39 = arith.addf %37, %38 : vector<10x8x128xf32>
    %cst_53 = arith.constant 5.000000e-01 : f32
    %40 = vector.broadcast %cst_53 : f32 to vector<10x8x128xf32>
    %41 = arith.mulf %40, %39 : vector<10x8x128xf32>
    %c0_54 = arith.constant 0 : index
    %c0_55 = arith.constant 0 : index
    %c0_56 = arith.constant 0 : index
    %42 = vector.load %arg12[%c0_54, %c0_55, %c0_56] : memref<10x8x128xf32, #tpu.memory_space<vmem>>, vector<10x8x128xf32>
    tpu.vector_store %arg12[%c0_54, %c0_55, %c0_56], %41 {strides = array<i32>} : memref<10x8x128xf32, #tpu.memory_space<vmem>>, vector<10x8x128xf32>,
    return
  }
  func.func @transform_0(%arg0: i32, %arg1: memref<2xi32, #tpu.memory_space<smem>>) -> (i32, i32) {
    %c0_i32 = arith.constant 0 : i32
    %c0_i32_0 = arith.constant 0 : i32
    return %arg0, %c0_i32 : i32, i32
  }
  func.func @transform_1(%arg0: i32, %arg1: memref<2xi32, #tpu.memory_space<smem>>) -> (i32, i32, i32) {
    %c0_i32 = arith.constant 0 : i32
    %c0_i32_0 = arith.constant 0 : i32
    %c0_i32_1 = arith.constant 0 : i32
    return %c0_i32, %arg0, %c0_i32_0 : i32, i32, i32
  }
  func.func @transform_2(%arg0: i32, %arg1: memref<2xi32, #tpu.memory_space<smem>>) -> (i32, i32) {
    %c0_i32 = arith.constant 0 : i32
    %c0_i32_0 = arith.constant 0 : i32
    %c0_i32_1 = arith.constant 0 : i32
    return %c0_i32, %c0_i32_0 : i32, i32
  }
  func.func @transform_3(%arg0: i32, %arg1: memref<2xi32, #tpu.memory_space<smem>>) -> (i32, i32) {
    %c0_i32 = arith.constant 0 : i32
    %c0_i32_0 = arith.constant 0 : i32
    %c0_i32_1 = arith.constant 0 : i32
    return %c0_i32, %c0_i32_0 : i32, i32
  }
  func.func @transform_4(%arg0: i32, %arg1: memref<2xi32, #tpu.memory_space<smem>>) -> (i32, i32) {
    %c0_i32 = arith.constant 0 : i32
    %c0_i32_0 = arith.constant 0 : i32
    %c0_i32_1 = arith.constant 0 : i32
    return %c0_i32, %c0_i32_0 : i32, i32
  }
  func.func @transform_5(%arg0: i32, %arg1: memref<2xi32, #tpu.memory_space<smem>>) -> (i32, i32) {
    %c0_i32 = arith.constant 0 : i32
    %c0_i32_0 = arith.constant 0 : i32
    %c0_i32_1 = arith.constant 0 : i32
    return %c0_i32, %c0_i32_0 : i32, i32
  }
  func.func @transform_6(%arg0: i32, %arg1: memref<2xi32, #tpu.memory_space<smem>>) -> (i32, i32) {
    %c0_i32 = arith.constant 0 : i32
    %c0_i32_0 = arith.constant 0 : i32
    %c0_i32_1 = arith.constant 0 : i32
    return %c0_i32, %c0_i32_0 : i32, i32
  }
  func.func @transform_7(%arg0: i32, %arg1: memref<2xi32, #tpu.memory_space<smem>>) -> (i32, i32) {
    %c0_i32 = arith.constant 0 : i32
    %c0_i32_0 = arith.constant 0 : i32
    %c0_i32_1 = arith.constant 0 : i32
    return %c0_i32, %c0_i32_0 : i32, i32
  }
  func.func @transform_8(%arg0: i32, %arg1: memref<2xi32, #tpu.memory_space<smem>>) -> (i32, i32) {
    %c0_i32 = arith.constant 0 : i32
    %c0_i32_0 = arith.constant 0 : i32
    %c0_i32_1 = arith.constant 0 : i32
    return %c0_i32, %c0_i32_0 : i32, i32
  }
  func.func @transform_9(%arg0: i32, %arg1: memref<2xi32, #tpu.memory_space<smem>>) -> (i32, i32) {
    %c0_i32 = arith.constant 0 : i32
    %c0_i32_0 = arith.constant 0 : i32
    %c0_i32_1 = arith.constant 0 : i32
    return %c0_i32, %c0_i32_0 : i32, i32
  }
  func.func @transform_10(%arg0: i32, %arg1: memref<2xi32, #tpu.memory_space<smem>>) -> (i32, i32, i32) {
    %c0_i32 = arith.constant 0 : i32
    %c0_i32_0 = arith.constant 0 : i32
    %c0_i32_1 = arith.constant 0 : i32
    return %c0_i32, %arg0, %c0_i32_0 : i32, i32, i32
  }
}

</mosaic_0001>

<bundles_post_ra>
// kernel: tpu_custom_call.1
= control target key start
LH: loop header
LB: loop body
LE: loop exit
PB: predicated region body
PF: predicated region fallthrough
CT: control target
= control target key end

     0   :  { %s3715_s0 = inlined_call_operand.vmem [shape: s32[2], index: 0, kind: input, shape index: {}]   ;;  %s3716_s1 = inlined_call_operand.vmem [shape: s32[16,1], index: 1, kind: input, shape index: {}]   ;;  %s3717_s2 = inlined_call_operand.hbm [shape: f32[10,16,128], index: 2, kind: input, shape index: {}]   ;;  %s3718_s3 = inlined_call_operand.hbm [shape: f32[128,384], index: 3, kind: input, shape index: {}]   ;;  %s3719_s4 = inlined_call_operand.hbm [shape: f32[128,384], index: 4, kind: input, shape index: {}]   ;;  %s3720_s5 = inlined_call_operand.vmem [shape: f32[1,384], index: 5, kind: input, shape index: {}]   ;;  %s3721_s6 = inlined_call_operand.vmem [shape: f32[1,128], index: 6, kind: input, shape index: {}]   ;;  %s3722_s7 = inlined_call_operand.hbm [shape: f32[128,384], index: 7, kind: input, shape index: {}]   ;;  %s3723_s8 = inlined_call_operand.hbm [shape: f32[128,384], index: 8, kind: input, shape index: {}]   ;;  %s3724_s9 = inlined_call_operand.vmem [shape: f32[1,384], index: 9, kind: input, shape index: {}]   ;;  %s3725_s10 = inlined_call_operand.vmem [shape: f32[1,128], index: 10, kind: input, shape index: {}]   ;;  %s3726_s11 = inlined_call_operand.hbm [shape: f32[10,16,128], index: 11, kind: output, shape index: {}]  }
   0x1   :  { %3735 = sst [smem:[#allocation91_spill]] %s3724_s9  ;;  %s16_s19 = sshll.u32 %s3715_s0, 4  ;;  %s17_s19 = int_to_ptr.vmem [resolvable:$true] %s16_s19 }
   0x2   :  { %3736 = sst [smem:[#allocation92_spill]] %s3726_s11  ;;  %s2499_s20 = scalar_lea.vmem %s17_s19, 16 }
   0x3   :  { %p2500_p0 = scmp.ne.s32.totalorder %s17_s19, %s2499_s20  ;;  %p2504_p1 = scmp.lt.s32.totalorder %s17_s19, %s17_s19 }
   0x4   :  { %p2505_p2 = scmp.lt.s32.totalorder %s2499_s20, %s2499_s20 }
   0x6   :  { %p2506_p3 = por %p2505_p2, %p2504_p1 }
   0x8   :  { %p2507_p4 = pnand %p2506_p3, %p2500_p0 }
   0xa   :  { %2510 = shalt.err (!%p2507_p4)  }
   0xb   :  { %s2739_s21 = smov [#allocation8]  }
   0xc   :  { %19 = dma.vmem_to_smem %s17_s19, 16, %s2739_s21, [#allocation7] }
   0xd   :  { %2701 = dma.done.wait [#allocation7], 16 }
   0xe   :  { %2702 = vsyncadd [#allocation7], 4294967280 }
   0xf   :  { %21 = sfence }
  0x10   :  { %22 = vsyncpa [#allocation10], 0 }
  0x11   :  { %24 = vsyncpa [#allocation10 + $0x1], 0 }
  0x12   :  { %25 = vsyncpa [#allocation13], 0 }
  0x13   :  { %26 = vsyncpa [#allocation16], 0 }
  0x14   :  { %27 = vsyncpa [#allocation11], 0 }
  0x15   :  { %29 = vsyncpa [#allocation11 + $0x1], 0  ;;  %s2822_s0 = smov 0   ;;  %s2824_s22 = smov 0  }
  0x16   :  { %s2826_s23 = smov 0   ;;  %s2828_s24 = smov 0  }
  0x17 LB: > { %3737 = sst [smem:[#allocation24_spill]] %s2721_s0  ;;  %s2843_s25 = sadd.s32 4294967295, %s2733_s24   ;;  %s2733_s24 = sphi %s2828_s24, %s3893_s24   ;;  %s2729_s23 = sphi %s2826_s23, %s3892_s23   ;;  %s2725_s22 = sphi %s2824_s22, %s3891_s22   ;;  %s2721_s0 = sphi %s2822_s0, %s3890_s0  }
  0x18   : > { %s1846_s26 = sadd.s32 4294967294, %s2733_s24   ;;  %p81_p5 = scmp.ne.s32.totalorder %s2725_s22, %s2721_s0 }
  0x19   : > { %p3727_p6 = scmp.eq.s32.totalorder %s2843_s25, 0  ;;  %p279_p8 = scmp.eq.s32.totalorder %s1846_s26, 1 }
  0x1a   : > { %p1847_p10 = scmp.ge.s32.totalorder %s2733_s24, 1  ;;  %p286_p12 = scmp.lt.s32.totalorder %s2733_s24, 3 }
  0x1b   : > { %p2852_p9 = por %p3727_p6, %p81_p5  ;;  %p2857_p11 = por %p279_p8, %p81_p5 }
  0x1c   : > { %p2862_p13 = pnand %p1847_p10, %p286_p12  ;;  %s2740_s30 = smov [#allocation12]  }
  0x1d   : > { %s3738_s27 = scalar_select %p2852_p9, 1, 0 }
  0x1e   : > { %s3739_s28 = scalar_select %p2857_p11, 1, 0 }
  0x1f   : > { %s3741_s29 = scalar_select %p2862_p13, 1, 0 }
  0x20   : > { %3740 = sst [smem:[#allocation25_spill]] %s3739_s28  ;;  %s298_s12 = sshll.u32 %s2740_s30, 4  ;;  %s2866_s12 = int_to_ptr.vmem [resolvable:$true] %s298_s12 }
  0x21   : > { %p2389_p0 = pneg %p2862_p13  ;;  %s2741_s14 = smov [#allocation15]  }
  0x22   : > { %s330_s15 = sshll.u32 %s2741_s14, 4  ;;  %s2742_s16 = smov [#allocation14]   ;;  %s2877_s15 = int_to_ptr.vmem [resolvable:$true] %s330_s15 }
  0x23   : > { %p2873_p2 = pnand %p2389_p0, %p3727_p6  ;;  %s2879_s17 = sshll.u32 %s2742_s16, 4  ;;  %s312_s17 = int_to_ptr.vmem [resolvable:$true] %s2879_s17 }
  0x24   : > { %s2511_s20 = scalar_lea.hbm %s3718_s3, 6144 }
  0x25   : > { %p2512_p3 = scmp.ne.s32.totalorder %s3718_s3, %s2511_s20  ;;  %p2889_p4 = pneg %p2873_p2 }
  0x26   : > { %p2518_p10 = scmp.lt.u32.totalorder %s2511_s20, %s3718_s3 }
  0x27   : > { %p2514_p5 = pnand %p2889_p4, %p2512_p3 }
  0x29   : > { %p2515_p8 = pneg %p2514_p5 }
  0x2b   : > { %p2520_p12 = pnand %p2518_p10, %p2515_p8 }
  0x2d   : > { %2523 = shalt.err (!%p2520_p12)
}
  0x2e   : > { %s2524_s18 = scalar_lea.vmem %s2866_s12, 6144  ;;  %p2532_p7 = scmp.lt.s32.totalorder %s2866_s12, %s2866_s12 }
  0x2f   : > { %p2525_p0 = scmp.ne.s32.totalorder %s2866_s12, %s2524_s18  ;;  %p2533_p11 = scmp.lt.s32.totalorder %s2524_s18, %s2524_s18 }
  0x31   : > { %p2527_p1 = pnand %p2525_p0, %p2889_p4  ;;  %p2534_p3 = por %p2533_p11, %p2532_p7 }
  0x33   : > { %p2528_p6 = pneg %p2527_p1 }
  0x35   : > { %p2535_p5 = pnand %p2534_p3, %p2528_p6 }
  0x37   : > { %2538 = shalt.err (!%p2535_p5)
}
  0x38   : > { %s2743_s19 = smov 384   ;;  %s2744_s20 = smov 24  }
  0x39   : > { %2392 = dma.hbm_to_vmem [thread:$0]  (!%p2873_p2), %s3718_s3, 6144, %s2866_s12, [#allocation13], %s2743_s19, %s2743_s19, %s2744_s20  }
  0x3a   : > { %s2539_s18 = scalar_lea.hbm %s3722_s7, 6144 }
  0x3b   : > { %p2540_p6 = scmp.ne.s32.totalorder %s3722_s7, %s2539_s18  ;;  %p2546_p1 = scmp.lt.u32.totalorder %s2539_s18, %s3722_s7 }
  0x3d   : > { %p2542_p7 = pnand %p2540_p6, %p2889_p4 }
  0x3f   : > { %p2543_p11 = pneg %p2542_p7 }
  0x41   : > { %p2548_p8 = pnand %p2546_p1, %p2543_p11 }
  0x43   : > { %2551 = shalt.err (!%p2548_p8)
}
  0x44   : > { %s2552_s12 = scalar_lea.vmem %s2877_s15, 6144  ;;  %p2560_p3 = scmp.lt.s32.totalorder %s2877_s15, %s2877_s15 }
  0x45   : > { %p2553_p10 = scmp.ne.s32.totalorder %s2877_s15, %s2552_s12  ;;  %p2561_p5 = scmp.lt.s32.totalorder %s2552_s12, %s2552_s12 }
  0x47   : > { %p2555_p12 = pnand %p2553_p10, %p2889_p4  ;;  %p2562_p6 = por %p2561_p5, %p2560_p3 }
  0x49   : > { %p2556_p0 = pneg %p2555_p12 }
  0x4b   : > { %p2563_p7 = pnand %p2562_p6, %p2556_p0 }
  0x4d   : > { %2566 = shalt.err (!%p2563_p7)
}
  0x4e   : > { %2398 = dma.hbm_to_vmem [thread:$0]  (!%p2873_p2), %s3722_s7, 6144, %s2877_s15, [#allocation16], %s2743_s19, %s2743_s19, %s2744_s20  }
  0x4f   : > { %s2567_s21 = scalar_lea.hbm %s3719_s4, 6144 }
  0x50   : > { %p2568_p11 = scmp.ne.s32.totalorder %s3719_s4, %s2567_s21  ;;  %p2574_p10 = scmp.lt.u32.totalorder %s2567_s21, %s3719_s4 }
  0x52   : > { %p2570_p1 = pnand %p2568_p11, %p2889_p4 }
  0x54   : > { %p2571_p8 = pneg %p2570_p1 }
  0x56   : > { %p2576_p12 = pnand %p2574_p10, %p2571_p8 }
  0x58   : > { %2579 = shalt.err (!%p2576_p12)
}
  0x59   : > { %s2580_s12 = scalar_lea.vmem %s312_s17, 6144  ;;  %p2588_p6 = scmp.lt.s32.totalorder %s312_s17, %s312_s17 }
  0x5a   : > { %p2581_p0 = scmp.ne.s32.totalorder %s312_s17, %s2580_s12  ;;  %p2589_p7 = scmp.lt.s32.totalorder %s2580_s12, %s2580_s12 }
  0x5c   : > { %p2583_p3 = pnand %p2581_p0, %p2889_p4  ;;  %p2590_p9 = por %p2589_p7, %p2588_p6 }
  0x5e   : > { %p2584_p5 = pneg %p2583_p3 }
  0x60   : > { %p2591_p13 = pnand %p2590_p9, %p2584_p5 }
  0x62   : > { %2594 = shalt.err (!%p2591_p13)
}
  0x63   : > { %2395 = dma.hbm_to_vmem [thread:$0]  (!%p2873_p2), %s3719_s4, 6144, %s312_s17, [#allocation13], %s2743_s19, %s2743_s19, %s2744_s20  }
  0x64   : > { %s2745_s11 = smov [#allocation17]   ;;  %s2595_s26 = scalar_lea.hbm %s3723_s8, 6144 }
  0x65   : > { %s343_s0 = sshll.u32 %s2745_s11, 4  ;;  %p2596_p9 = scmp.ne.s32.totalorder %s3723_s8, %s2595_s26  ;;  %s344_s0 = int_to_ptr.vmem [resolvable:$true] %s343_s0 }
  0x66   : > { %p2602_p1 = scmp.lt.u32.totalorder %s2595_s26, %s3723_s8 }
  0x67   : > { %p2598_p13 = pnand %p2596_p9, %p2889_p4 }
  0x69   : > { %p2599_p11 = pneg %p2598_p13 }
  0x6b   : > { %p2604_p8 = pnand %p2602_p1, %p2599_p11 }
  0x6d   : > { %2607 = shalt.err (!%p2604_p8)
}
  0x6e   : > { %s2608_s17 = scalar_lea.vmem %s344_s0, 6144  ;;  %p2616_p3 = scmp.lt.s32.totalorder %s344_s0, %s344_s0 }
  0x6f   : > { %p2609_p10 = scmp.ne.s32.totalorder %s344_s0, %s2608_s17  ;;  %p2617_p5 = scmp.lt.s32.totalorder %s2608_s17, %s2608_s17 }
  0x71   : > { %p2611_p12 = pnand %p2609_p10, %p2889_p4  ;;  %p2618_p6 = por %p2617_p5, %p2616_p3 }
  0x73   : > { %p2612_p0 = pneg %p2611_p12 }
  0x75   : > { %p2619_p7 = pnand %p2618_p6, %p2612_p0 }
  0x77   : > { %2622 = shalt.err (!%p2619_p7)
}
  0x78   : > { %2401 = dma.hbm_to_vmem [thread:$0]  (!%p2873_p2), %s3723_s8, 6144, %s344_s0, [#allocation16], %s2743_s19, %s2743_s19, %s2744_s20  }
  0x79   : > { %s2983_s30 = sadd.s32 1, %s2733_s24   ;;  %s68_s13 = sadd.s32 1, %s2729_s23 }
  0x7a   : > { %s65_s11 = ssub.s32 %s2733_s24, %s2983_s30  ;;  %p75_p4 = scmp.ne.s32.totalorder %s2729_s23, %s2725_s22 }
  0x7b   : > { %p66_p9 = scmp.eq.s32.totalorder %s65_s11, 0  ;;  %p76_p13 = scmp.eq.s32.totalorder %s2733_s24, 0 }
  0x7c   : > { %p3744_p11 = scmp.eq.s32.totalorder %s2843_s25, 1  ;;  %p2414_p8 = scmp.lt.s32.totalorder %s2733_s24, 2 }
  0x7d   : > { %s2999_s21 = scalar_select %p66_p9, %s2729_s23, %s68_s13  }
  0x7e   : > { %p2993_p1 = por %p3744_p11, %p75_p4  ;;  %p77_p10 = por %p76_p13, %p75_p4 }
  0x7f   : > { %s370_s26 = sand.u32 1, %s2729_s23   ;;  %s1853_s19 = sshll.u32 %s2733_s24, 7 }
  0x80   : > { %s2367_s14 = smul.u32 80, %s370_s26  ;;  %p3003_p2 = pnand %p2414_p8, %p77_p10 }
  0x81   : > { %s3010_s18 = scalar_lea.hbm %s3717_s2, %s1853_s19  ;;  %s3014_s15 = scalar_lea.sflag [#allocation10], %s370_s26 }
  0x82   : > { %s374_s12 = scalar_lea.vmem [#allocation9], %s2367_s14  ;;  %s2623_s9 = scalar_lea.hbm %s3010_s18, 1280 }
  0x83   : > { %s380_s17 = sshll.u32 %s374_s12, 4  ;;  %p2624_p12 = scmp.ne.s32.totalorder %s3010_s18, %s2623_s9  ;;  %s3012_s17 = int_to_ptr.vmem [resolvable:$true] %s380_s17 }
  0x84   : > { %p2625_p0 = pneg %p3003_p2  ;;  %s2628_s19 = scalar_lea.hbm %s3717_s2, 2560 }
  0x85   : > { %p2629_p6 = scmp.lt.u32.totalorder %s3010_s18, %s3717_s2  ;;  %p2630_p7 = scmp.lt.u32.totalorder %s2628_s19, %s2623_s9 }
  0x86   : > { %p2626_p3 = pnand %p2625_p0, %p2624_p12  ;;  %p2632_p9 = scmp.lt.u32.totalorder %s2623_s9, %s3010_s18 }
  0x87   : > { %p2631_p4 = por %p2630_p7, %p2629_p6 }
  0x88   : > { %p2627_p5 = pneg %p2626_p3 }
  0x89   : > { %p2633_p13 = por %p2632_p9, %p2631_p4 }
  0x8b   : > { %p2634_p11 = pnand %p2633_p13, %p2627_p5 }
  0x8d   : > { %2637 = shalt.err (!%p2634_p11)
}
  0x8e   : > { %s2638_s26 = scalar_lea.vmem %s3012_s17, 1280  ;;  %s2746_s14 = smov [#allocation9]  }
  0x8f   : > { %p2639_p8 = scmp.ne.s32.totalorder %s3012_s17, %s2638_s26  ;;  %s2643_s12 = sshll.u32 %s2746_s14, 4  ;;  %s2644_s12 = int_to_ptr.vmem [resolvable:$false] %s2643_s12 }
  0x90   : > { %s2645_s13 = scalar_lea.vmem %s2644_s12, 2560  ;;  %p2646_p3 = scmp.lt.s32.totalorder %s3012_s17, %s2644_s12 }
  0x91   : > { %p2641_p10 = pnand %p2639_p8, %p2625_p0  ;;  %p2647_p6 = scmp.lt.s32.totalorder %s2645_s13, %s2638_s26 }
  0x93   : > { %p2642_p12 = pneg %p2641_p10  ;;  %p2648_p7 = por %p2647_p6, %p2646_p3 }
  0x95   : > { %p2649_p4 = pnand %p2648_p7, %p2642_p12 }
  0x97   : > { %2652 = shalt.err (!%p2649_p4)
}
  0x98   : > { %s2747_s9 = smov 256   ;;  %s2748_s11 = smov 128  }
  0x99   : > { %s2749_s19 = smov 8   ;;  %p3747_p0 = scmp.ne.s32.totalorder %s3741_s29, 0 }
  0x9a   : > { %2405 = dma.hbm_to_vmem [thread:$0]  (!%p3003_p2), %s3010_s18, 1280, %s3012_s17, %s3014_s15, %s2747_s9, %s2748_s11, %s2749_s19  }
  0x9b   : > { %392 = sbr.rel (%p3747_p0) target bundleno = 897 (0x381), region = 60 }
  0xa2   : > { %s3045_s0 = sand.u32 1, %s2725_s22   ;;  %p3748_p5 = scmp.ne.s32.totalorder %s3738_s27, 0 }
  0xa3   : > { %s2368_s16 = smul.u32 80, %s3045_s0  ;;  %s395_s26 = scalar_lea.sflag [#allocation10], %s3045_s0 }
  0xa5   : > { %s3049_s14 = scalar_lea.vmem [#allocation9], %s2368_s16 }
  0xa6   : > { %2704 = dma.done.wait (%p3748_p5), %s395_s26, 1280  }
  0xa7   : > { %2706 = vsyncadd (%p3748_p5), %s395_s26, 4294966016  ;;  %p3749_p2 = scmp.eq.s32.totalorder %s2843_s25, 0 }
  0xa9   : > { %2708 = dma.done.wait (%p3749_p2), [#allocation13], 12288   ;;  %p3750_p9 = pmov %p3749_p2 }
  0xaa   : > { %p3751_p13 = pmov %p3749_p2 }
  0xab   : > { %2710 = vsyncadd (%p3750_p9), [#allocation13], 4294955008 }
  0xac   : > { %2712 = dma.done.wait (%p3751_p13), [#allocation16], 12288   ;;  %p3752_p11 = pmov %p3749_p2 }
  0xad   : > { %p455_p8 = scmp.lt.s32.totalorder %s2843_s25, 1  ;;  %s3065_s29 = sld [smem:[#allocation8 + %s2843_s25]]  ;;  %v3733_v0 = vmov 0.0   ;;  %v3110_v2 = vld [vmem:[#allocation14] sm:$0xff]  ;;  %v3112_v3 = vld [vmem:[#allocation14 + $0x8] sm:$0xff]  ;;  %v3114_v4 = vld [vmem:[#allocation14 + $0x10] sm:$0xff] }
  0xae   : > { %2714 = vsyncadd (%p3752_p11), [#allocation16], 4294955008  ;;  %599 = vmatprep.mubr.f32.mxu0 %v3733_v0  ;;  %s3068_s27 = scalar_lea.vmem [#allocation18], %s2368_s16  ;;  %1150 = vst [vmem:[#allocation4] sm:$0xff] %v3733_v0  ;;  %v3116_v5 = vld [vmem:[#allocation14 + $0x18] sm:$0xff]  ;;  %v3118_v6 = vld [vmem:[#allocation14 + $0x20] sm:$0xff] }
  0xaf   : > { %1140 = vst [vmem:[%s3068_s27] sm:$0xff] %v3733_v0  ;;  %1141 = vst [vmem:[%s3068_s27 + $0x8] sm:$0xff] %v3733_v0  ;;  %s456_s20 = scalar_select %p455_p8, %s2843_s25, 1  ;;  %v3120_v7 = vld [vmem:[#allocation14 + $0x28] sm:$0xff]  ;;  %v3122_v8 = vld [vmem:[#allocation14 + $0x30] sm:$0xff] }
  0xb0   : > { %1142 = vst [vmem:[%s3068_s27 + $0x10] sm:$0xff] %v3733_v0  ;;  %1143 = vst [vmem:[%s3068_s27 + $0x18] sm:$0xff] %v3733_v0  ;;  %v3124_v9 = vld [vmem:[#allocation14 + $0x38] sm:$0xff]  ;;  %v3126_v10 = vld [vmem:[#allocation14 + $0x40] sm:$0xff] }
  0xb1   : > { %1144 = vst [vmem:[%s3068_s27 + $0x20] sm:$0xff] %v3733_v0  ;;  %1145 = vst [vmem:[%s3068_s27 + $0x28] sm:$0xff] %v3733_v0  ;;  %s1859_s18 = sshll.u32 %s456_s20, 3  ;;  %v3128_v11 = vld [vmem:[#allocation14 + $0x48] sm:$0xff]  ;;  %v3130_v12 = vld [vmem:[#allocation14 + $0x50] sm:$0xff] }
  0xb2   : > { %1146 = vst [vmem:[%s3068_s27 + $0x30] sm:$0xff] %v3733_v0  ;;  %1147 = vst [vmem:[%s3068_s27 + $0x38] sm:$0xff] %v3733_v0  ;;  %s458_s12 = scalar_lea.vmem %s3716_s1, %s1859_s18  ;;  %v3132_v13 = vld [vmem:[#allocation14 + $0x58] sm:$0xff]  ;;  %v3134_v14 = vld [vmem:[#allocation14 + $0x60] sm:$0xff]  ;;  %s3819_s18 = sld [smem:[#allocation91_spill]] }
  0xb3   : > { %1148 = vst [vmem:[%s3068_s27 + $0x40] sm:$0xff] %v3733_v0  ;;  %1149 = vst [vmem:[%s3068_s27 + $0x48] sm:$0xff] %v3733_v0  ;;  %v3108_v1 = vld [vmem:[%s458_s12] sm:$0xff]  ;;  %v3136_v15 = vld [vmem:[#allocation14 + $0x68] sm:$0xff]  ;;  %p1860_p10 = scmp.le.s32.totalorder %s3065_s29, 0 }
  0xb4   : > { %1151 = vst [vmem:[#allocation4 + $0x8] sm:$0xff] %v3733_v0  ;;  %1152 = vst [vmem:[#allocation4 + $0x10] sm:$0xff] %v3733_v0  ;;  %v3138_v16 = vld [vmem:[#allocation14 + $0x70] sm:$0xff]  ;;  %v3140_v17 = vld [vmem:[#allocation14 + $0x78] sm:$0xff]  ;;  %s3485_s17 = smov (!%p1860_p10), 0  }
  0xb5   : > { %1153 = vst [vmem:[#allocation4 + $0x18] sm:$0xff] %v3733_v0  ;;  %1154 = vst [vmem:[#allocation4 + $0x20] sm:$0xff] %v3733_v0  ;;  %v3142_v18 = vld [vmem:[#allocation14 + $0x80] sm:$0xff]  ;;  %v3144_v19 = vld [vmem:[#allocation14 + $0x88] sm:$0xff] }
  0xb6   : > { %1155 = vst [vmem:[#allocation4 + $0x28] sm:$0xff] %v3733_v0  ;;  %1156 = vst [vmem:[#allocation4 + $0x30] sm:$0xff] %v3733_v0  ;;  %v3146_v20 = vld [vmem:[#allocation14 + $0x90] sm:$0xff]  ;;  %v3148_v21 = vld [vmem:[#allocation14 + $0x98] sm:$0xff] }
  0xb7   : > { %1157 = vst [vmem:[#allocation4 + $0x38] sm:$0xff] %v3733_v0  ;;  %1158 = vst [vmem:[#allocation4 + $0x40] sm:$0xff] %v3733_v0  ;;  %v3150_v22 = vld [vmem:[#allocation14 + $0xa0] sm:$0xff]  ;;  %v3152_v23 = vld [vmem:[#allocation14 + $0xa8] sm:$0xff] }
  0xb8   : > { %1159 = vst [vmem:[#allocation4 + $0x48] sm:$0xff] %v3733_v0  ;;  %1160 = vst [vmem:[#allocation5] sm:$0xff] %v3733_v0  ;;  %v3154_v24 = vld [vmem:[#allocation14 + $0xb0] sm:$0xff]  ;;  %v3156_v25 = vld [vmem:[#allocation14 + $0xb8] sm:$0xff] }
  0xb9   : > { %1161 = vst [vmem:[#allocation6] sm:$0xff] %v3733_v0  ;;  %v3158_v26 = vld [vmem:[#allocation14 + $0xc0] sm:$0xff]  ;;  %v3160_v27 = vld [vmem:[#allocation14 + $0xc8] sm:$0xff]  ;;  %v3162_v28 = vld [vmem:[#allocation14 + $0xd0] sm:$0xff] }
  0xba   : > { %v3164_v29 = vld [vmem:[#allocation14 + $0xd8] sm:$0xff]  ;;  %v3166_v30 = vld [vmem:[#allocation14 + $0xe0] sm:$0xff]  ;;  %v3168_v31 = vld [vmem:[#allocation14 + $0xe8] sm:$0xff] }
  0xbb   : > { %v3170_v32 = vld [vmem:[#allocation14 + $0xf0] sm:$0xff]  ;;  %v3172_v33 = vld [vmem:[#allocation14 + $0xf8] sm:$0xff]  ;;  %v3174_v34 = vld [vmem:[#allocation14 + $0x100] sm:$0xff] }
  0xbc   : > { %3753 = vst [vmem:[#allocation26_spill] sm:$0xff] %v3174_v34  ;;  %v3176_v35 = vld [vmem:[#allocation14 + $0x108] sm:$0xff]  ;;  %v3178_v36 = vld [vmem:[#allocation14 + $0x110] sm:$0xff]  ;;  %v3180_v37 = vld [vmem:[#allocation14 + $0x118] sm:$0xff] }
  0xbd   : > { %3754 = vst [vmem:[#allocation27_spill] sm:$0xff] %v3176_v35  ;;  %3755 = vst [vmem:[#allocation28_spill] sm:$0xff] %v3180_v37  ;;  %v3182_v38 = vld [vmem:[#allocation14 + $0x120] sm:$0xff]  ;;  %v3184_v39 = vld [vmem:[#allocation14 + $0x128] sm:$0xff] }
  0xbe   : > { %3756 = vst [vmem:[#allocation29_spill] sm:$0xff] %v3182_v38  ;;  %3757 = vst [vmem:[#allocation30_spill] sm:$0xff] %v3184_v39  ;;  %v3186_v40 = vld [vmem:[#allocation14 + $0x130] sm:$0xff]  ;;  %v3188_v41 = vld [vmem:[#allocation14 + $0x138] sm:$0xff] }
  0xbf   : > { %3758 = vst [vmem:[#allocation31_spill] sm:$0xff] %v3186_v40  ;;  %3759 = vst [vmem:[#allocation32_spill] sm:$0xff] %v3188_v41  ;;  %v3190_v42 = vld [vmem:[#allocation14 + $0x140] sm:$0xff]  ;;  %v3192_v43 = vld [vmem:[#allocation14 + $0x148] sm:$0xff] }
  0xc0   : > { %3760 = vst [vmem:[#allocation33_spill] sm:$0xff] %v3190_v42  ;;  %3761 = vst [vmem:[#allocation34_spill] sm:$0xff] %v3192_v43  ;;  %v3194_v44 = vld [vmem:[#allocation14 + $0x150] sm:$0xff]  ;;  %v3196_v45 = vld [vmem:[#allocation14 + $0x158] sm:$0xff] }
  0xc1   : > { %3762 = vst [vmem:[#allocation35_spill] sm:$0xff] %v3194_v44  ;;  %3763 = vst [vmem:[#allocation36_spill] sm:$0xff] %v3196_v45  ;;  %v3198_v46 = vld [vmem:[#allocation14 + $0x160] sm:$0xff]  ;;  %v3200_v47 = vld [vmem:[#allocation14 + $0x168] sm:$0xff] }
  0xc2   : > { %3764 = vst [vmem:[#allocation37_spill] sm:$0xff] %v3198_v46  ;;  %3765 = vst [vmem:[#allocation38_spill] sm:$0xff] %v3200_v47  ;;  %v3202_v48 = vld [vmem:[#allocation14 + $0x170] sm:$0xff]  ;;  %v3204_v49 = vld [vmem:[#allocation14 + $0x178] sm:$0xff] }
  0xc3   : > { %3766 = vst [vmem:[#allocation39_spill] sm:$0xff] %v3202_v48  ;;  %3767 = vst [vmem:[#allocation40_spill] sm:$0xff] %v3204_v49  ;;  %v3206_v50 = vld [vmem:[#allocation17] sm:$0xff]  ;;  %v3208_v51 = vld [vmem:[#allocation17 + $0x8] sm:$0xff] }
  0xc4   : > { %3768 = vst [vmem:[#allocation41_spill] sm:$0xff] %v3206_v50  ;;  %3769 = vst [vmem:[#allocation42_spill] sm:$0xff] %v3208_v51  ;;  %v3210_v52 = vld [vmem:[#allocation17 + $0x10] sm:$0xff]  ;;  %v3212_v53 = vld [vmem:[#allocation17 + $0x18] sm:$0xff] }
  0xc5   : > { %3770 = vst [vmem:[#allocation43_spill] sm:$0xff] %v3210_v52  ;;  %3771 = vst [vmem:[#allocation44_spill] sm:$0xff] %v3212_v53  ;;  %v3214_v54 = vld [vmem:[#allocation17 + $0x20] sm:$0xff]  ;;  %v3216_v55 = vld [vmem:[#allocation17 + $0x28] sm:$0xff] }
  0xc6   : > { %3772 = vst [vmem:[#allocation45_spill] sm:$0xff] %v3214_v54  ;;  %3773 = vst [vmem:[#allocation46_spill] sm:$0xff] %v3216_v55  ;;  %v3218_v56 = vld [vmem:[#allocation17 + $0x30] sm:$0xff]  ;;  %v3220_v57 = vld [vmem:[#allocation17 + $0x38] sm:$0xff] }
  0xc7   : > { %3774 = vst [vmem:[#allocation47_spill] sm:$0xff] %v3218_v56  ;;  %3775 = vst [vmem:[#allocation48_spill] sm:$0xff] %v3220_v57  ;;  %v3222_v58 = vld [vmem:[#allocation17 + $0x40] sm:$0xff]  ;;  %v3224_v59 = vld [vmem:[#allocation17 + $0x48] sm:$0xff] }
  0xc8   : > { %3776 = vst [vmem:[#allocation49_spill] sm:$0xff] %v3222_v58  ;;  %3777 = vst [vmem:[#allocation50_spill] sm:$0xff] %v3224_v59  ;;  %v3226_v60 = vld [vmem:[#allocation17 + $0x50] sm:$0xff]  ;;  %v3228_v61 = vld [vmem:[#allocation17 + $0x58] sm:$0xff] }
  0xc9   : > { %3778 = vst [vmem:[#allocation51_spill] sm:$0xff] %v3226_v60  ;;  %3779 = vst [vmem:[#allocation52_spill] sm:$0xff] %v3228_v61  ;;  %v3230_v62 = vld [vmem:[#allocation17 + $0x60] sm:$0xff]  ;;  %v3232_v63 = vld [vmem:[#allocation17 + $0x68] sm:$0xff] }
  0xca   : > { %3780 = vst [vmem:[#allocation53_spill] sm:$0xff] %v3230_v62  ;;  %3781 = vst [vmem:[#allocation54_spill] sm:$0xff] %v3232_v63  ;;  %v3234_v0 = vld [vmem:[#allocation17 + $0x70] sm:$0xff]  ;;  %v3236_v52 = vld [vmem:[#allocation17 + $0x78] sm:$0xff] }
  0xcb   : > { %3782 = vst [vmem:[#allocation55_spill] sm:$0xff] %v3234_v0  ;;  %3783 = vst [vmem:[#allocation56_spill] sm:$0xff] %v3236_v52  ;;  %v3238_v55 = vld [vmem:[#allocation17 + $0x80] sm:$0xff]  ;;  %v3240_v56 = vld [vmem:[#allocation17 + $0x88] sm:$0xff] }
  0xcc   : > { %3784 = vst [vmem:[#allocation57_spill] sm:$0xff] %v3238_v55  ;;  %3785 = vst [vmem:[#allocation58_spill] sm:$0xff] %v3240_v56  ;;  %v3242_v57 = vld [vmem:[#allocation17 + $0x90] sm:$0xff]  ;;  %v3244_v58 = vld [vmem:[#allocation17 + $0x98] sm:$0xff] }
  0xcd   : > { %3786 = vst [vmem:[#allocation59_spill] sm:$0xff] %v3242_v57  ;;  %3787 = vst [vmem:[#allocation60_spill] sm:$0xff] %v3244_v58  ;;  %v3246_v59 = vld [vmem:[#allocation17 + $0xa0] sm:$0xff]  ;;  %v3248_v60 = vld [vmem:[#allocation17 + $0xa8] sm:$0xff] }
  0xce   : > { %3788 = vst [vmem:[#allocation61_spill] sm:$0xff] %v3246_v59  ;;  %3789 = vst [vmem:[#allocation62_spill] sm:$0xff] %v3248_v60  ;;  %v3250_v61 = vld [vmem:[#allocation17 + $0xb0] sm:$0xff]  ;;  %v3252_v62 = vld [vmem:[#allocation17 + $0xb8] sm:$0xff] }
  0xcf   : > { %3790 = vst [vmem:[#allocation63_spill] sm:$0xff] %v3250_v61  ;;  %3791 = vst [vmem:[#allocation64_spill] sm:$0xff] %v3252_v62  ;;  %v3254_v63 = vld [vmem:[#allocation17 + $0xc0] sm:$0xff]  ;;  %v3256_v0 = vld [vmem:[#allocation17 + $0xc8] sm:$0xff] }
  0xd0   : > { %3792 = vst [vmem:[#allocation65_spill] sm:$0xff] %v3254_v63  ;;  %3793 = vst [vmem:[#allocation66_spill] sm:$0xff] %v3256_v0  ;;  %v3258_v52 = vld [vmem:[#allocation17 + $0xd0] sm:$0xff]  ;;  %v3260_v55 = vld [vmem:[#allocation17 + $0xd8] sm:$0xff] }
  0xd1   : > { %3794 = vst [vmem:[#allocation67_spill] sm:$0xff] %v3258_v52  ;;  %3795 = vst [vmem:[#allocation68_spill] sm:$0xff] %v3260_v55  ;;  %v3262_v56 = vld [vmem:[#allocation17 + $0xe0] sm:$0xff]  ;;  %v3264_v57 = vld [vmem:[#allocation17 + $0xe8] sm:$0xff] }
  0xd2   : > { %3796 = vst [vmem:[#allocation69_spill] sm:$0xff] %v3262_v56  ;;  %3797 = vst [vmem:[#allocation70_spill] sm:$0xff] %v3264_v57  ;;  %v3266_v58 = vld [vmem:[#allocation17 + $0xf0] sm:$0xff]  ;;  %v3268_v59 = vld [vmem:[#allocation17 + $0xf8] sm:$0xff] }
  0xd3   : > { %3798 = vst [vmem:[#allocation71_spill] sm:$0xff] %v3266_v58  ;;  %3799 = vst [vmem:[#allocation72_spill] sm:$0xff] %v3268_v59  ;;  %v3270_v60 = vld [vmem:[#allocation17 + $0x100] sm:$0xff]  ;;  %v3272_v61 = vld [vmem:[#allocation17 + $0x108] sm:$0xff] }
  0xd4   : > { %3800 = vst [vmem:[#allocation73_spill] sm:$0xff] %v3270_v60  ;;  %3801 = vst [vmem:[#allocation74_spill] sm:$0xff] %v3272_v61  ;;  %v3274_v62 = vld [vmem:[#allocation17 + $0x110] sm:$0xff]  ;;  %v3276_v63 = vld [vmem:[#allocation17 + $0x118] sm:$0xff] }
  0xd5   : > { %3802 = vst [vmem:[#allocation75_spill] sm:$0xff] %v3274_v62  ;;  %3803 = vst [vmem:[#allocation76_spill] sm:$0xff] %v3276_v63  ;;  %v3278_v0 = vld [vmem:[#allocation17 + $0x120] sm:$0xff]  ;;  %v3280_v52 = vld [vmem:[#allocation17 + $0x128] sm:$0xff] }
  0xd6   : > { %3804 = vst [vmem:[#allocation77_spill] sm:$0xff] %v3278_v0  ;;  %3805 = vst [vmem:[#allocation78_spill] sm:$0xff] %v3280_v52  ;;  %v3282_v55 = vld [vmem:[#allocation17 + $0x130] sm:$0xff]  ;;  %v3284_v56 = vld [vmem:[#allocation17 + $0x138] sm:$0xff] }
  0xd7   : > { %3806 = vst [vmem:[#allocation79_spill] sm:$0xff] %v3282_v55  ;;  %3807 = vst [vmem:[#allocation80_spill] sm:$0xff] %v3284_v56  ;;  %v3286_v57 = vld [vmem:[#allocation17 + $0x140] sm:$0xff]  ;;  %v3288_v58 = vld [vmem:[#allocation17 + $0x148] sm:$0xff] }
  0xd8   : > { %3808 = vst [vmem:[#allocation81_spill] sm:$0xff] %v3286_v57  ;;  %3809 = vst [vmem:[#allocation82_spill] sm:$0xff] %v3288_v58  ;;  %v3290_v59 = vld [vmem:[#allocation17 + $0x150] sm:$0xff]  ;;  %v3292_v60 = vld [vmem:[#allocation17 + $0x158] sm:$0xff] }
  0xd9   : > { %3810 = vst [vmem:[#allocation83_spill] sm:$0xff] %v3290_v59  ;;  %3811 = vst [vmem:[#allocation84_spill] sm:$0xff] %v3292_v60  ;;  %v3294_v61 = vld [vmem:[#allocation17 + $0x160] sm:$0xff]  ;;  %v3296_v62 = vld [vmem:[#allocation17 + $0x168] sm:$0xff] }
  0xda   : > { %3812 = vst [vmem:[#allocation85_spill] sm:$0xff] %v3294_v61  ;;  %3813 = vst [vmem:[#allocation86_spill] sm:$0xff] %v3296_v62  ;;  %v3298_v63 = vld [vmem:[#allocation17 + $0x170] sm:$0xff]  ;;  %v3300_v0 = vld [vmem:[#allocation17 + $0x178] sm:$0xff] }
  0xdb   : > { %3814 = vst [vmem:[#allocation87_spill] sm:$0xff] %v3298_v63  ;;  %3815 = vst [vmem:[#allocation88_spill] sm:$0xff] %v3300_v0  ;;  %v3305_v55 = vld [vmem:[%s3721_s6] ss:$0 sm:$0xff]  ;;  %v472_v59 = vld [vmem:[#allocation12 + $0x10] sm:$0xff] }
  0xdc   : > { %3816 = vst [vmem:[#allocation89_spill] sm:$0xff] %v3305_v55  ;;  %v3310_v58 = vld [vmem:[%s3725_s10] ss:$0 sm:$0xff]  ;;  %v475_v60 = vld [vmem:[#allocation12 + $0x28] sm:$0xff]  ;;  %v481_v57 = vld [vmem:[#allocation12 + $0x58] sm:$0xff] }
  0xdd   : > { %3817 = vst [vmem:[#allocation90_spill] sm:$0xff] %v3310_v58  ;;  %v478_v56 = vld [vmem:[#allocation12 + $0x40] sm:$0xff]  ;;  %v2159_v61 = vpack.c.bf16 %v475_v60, %v472_v59  ;;  %v484_v62 = vld [vmem:[#allocation12 + $0x70] sm:$0xff]  ;;  %v487_v52 = vld [vmem:[#allocation12 + $0x88] sm:$0xff] }
  0xde   : > { %v2163_v63 = vpack.c.bf16 %v481_v57, %v478_v56  ;;  %v471_v53 = vld [vmem:[#allocation12 + $0x8] sm:$0xff]  ;;  %v474_v0 = vld [vmem:[#allocation12 + $0x20] sm:$0xff]  ;;  %v473_v46 = vld [vmem:[#allocation12 + $0x18] sm:$0xff]  ;;  %v2167_v58 = vpack.c.bf16 %v487_v52, %v484_v62 }
  0xdf   : > { %v470_v50 = vld [vmem:[#allocation12] sm:$0xff]  ;;  %2160 = vmatprep.subr.bf16.mxu1 %v2159_v61  ;;  %v2127_v49 = vpack.c.bf16 %v474_v0, %v471_v53  ;;  %v477_v54 = vld [vmem:[#allocation12 + $0x38] sm:$0xff]  ;;  %v480_v51 = vld [vmem:[#allocation12 + $0x50] sm:$0xff] }
  0xe0   : > { %2162 = vmatpush3.bf16.msra.mxu1 %v2159_v61  ;;  %v2129_v55 = vpack.c.bf16 %v473_v46, %v470_v50  ;;  %v476_v47 = vld [vmem:[#allocation12 + $0x30] sm:$0xff]  ;;  %v490_v44 = vld [vmem:[#allocation12 + $0xa0] sm:$0xff]  ;;  %v2131_v59 = vpack.c.bf16 %v480_v51, %v477_v54  ;;  %v479_v60 = vld [vmem:[#allocation12 + $0x48] sm:$0xff] }
  0xe1   : > { %2164 = vmatprep.subr.bf16.mxu1 %v2163_v63  ;;  %2128 = vmatprep.subr.bf16.mxu0 %v2127_v49  ;;  %v493_v43 = vld [vmem:[#allocation12 + $0xb8] sm:$0xff]  ;;  %v2133_v56 = vpack.c.bf16 %v479_v60, %v476_v47  ;;  %v483_v57 = vld [vmem:[#allocation12 + $0x68] sm:$0xff]  ;;  %v486_v40 = vld [vmem:[#allocation12 + $0x80] sm:$0xff] }
  0xe2   : > { %2130 = vmatpush1.bf16.msra.mxu0 %v2129_v55  ;;  %v2135_v48 = vpack.c.bf16 %v486_v40, %v483_v57  ;;  %v482_v0 = vld [vmem:[#allocation12 + $0x60] sm:$0xff]  ;;  %v485_v53 = vld [vmem:[#allocation12 + $0x78] sm:$0xff]  ;;  %v492_v50 = vld [vmem:[#allocation12 + $0xb0] sm:$0xff]  ;;  %v2171_v61 = vpack.c.bf16 %v493_v43, %v490_v44 }
  0xe3   : > { %2132 = vmatprep.subr.bf16.mxu0 %v2131_v59  ;;  %v489_v46 = vld [vmem:[#allocation12 + $0x98] sm:$0xff]  ;;  %v496_v49 = vld [vmem:[#allocation12 + $0xd0] sm:$0xff]  ;;  %v499_v52 = vld [vmem:[#allocation12 + $0xe8] sm:$0xff]  ;;  %v2137_v51 = vpack.c.bf16 %v485_v53, %v482_v0 }
  0xe4   : > { %2166 = vmatpush3.bf16.msra.mxu1 %v2163_v63  ;;  %v2139_v54 = vpack.c.bf16 %v492_v50, %v489_v46  ;;  %v488_v55 = vld [vmem:[#allocation12 + $0x90] sm:$0xff]  ;;  %v491_v47 = vld [vmem:[#allocation12 + $0xa8] sm:$0xff]  ;;  %v498_v59 = vld [vmem:[#allocation12 + $0xe0] sm:$0xff]  ;;  %v2175_v63 = vpack.c.bf16 %v499_v52, %v496_v49 }
  0xe5   : > { %2168 = vmatprep.subr.bf16.mxu1 %v2167_v58  ;;  %v495_v62 = vld [vmem:[#allocation12 + $0xc8] sm:$0xff]  ;;  %v3313_v40 = vld [vmem:[%s3049_s14] sm:$0xff]  ;;  %v505_v43 = vld [vmem:[#allocation12 + $0x118] sm:$0xff]  ;;  %v2141_v44 = vpack.c.bf16 %v491_v47, %v488_v55 }
  0xe6   : > { %2134 = vmatpush1.bf16.msra.mxu0 %v2133_v56  ;;  %1995 = vmatprep.mubr.f32.mxu1 %v3313_v40  ;;  %v502_v60 = vld [vmem:[#allocation12 + $0x100] sm:$0xff]  ;;  %v2143_v56 = vpack.c.bf16 %v498_v59, %v495_v62  ;;  %v501_v0 = vld [vmem:[#allocation12 + $0xf8] sm:$0xff]  ;;  %v504_v53 = vld [vmem:[#allocation12 + $0x110] sm:$0xff] }
  0xe7   : > { %2136 = vmatprep.subr.bf16.mxu0 %v2135_v48  ;;  %v494_v57 = vld [vmem:[#allocation12 + $0xc0] sm:$0xff]  ;;  %v497_v48 = vld [vmem:[#allocation12 + $0xd8] sm:$0xff]  ;;  %v508_v46 = vld [vmem:[#allocation12 + $0x130] sm:$0xff]  ;;  %v2147_v49 = vpack.c.bf16 %v504_v53, %v501_v0 }
  0xe8   : > { %2170 = vmatpush3.bf16.msra.mxu1 %v2167_v58  ;;  %v2179_v58 = vpack.c.bf16 %v505_v43, %v502_v60  ;;  %v511_v50 = vld [vmem:[#allocation12 + $0x148] sm:$0xff]  ;;  %v2145_v45 = vpack.c.bf16 %v497_v48, %v494_v57  ;;  %v500_v52 = vld [vmem:[#allocation12 + $0xf0] sm:$0xff]  ;;  %v510_v55 = vld [vmem:[#allocation12 + $0x140] sm:$0xff] }
  0xe9   : > { %2172 = vmatprep.subr.bf16.mxu1 %v2171_v61  ;;  %v507_v41 = vld [vmem:[#allocation12 + $0x128] sm:$0xff]  ;;  %v514_v47 = vld [vmem:[#allocation12 + $0x160] sm:$0xff]  ;;  %v509_v43 = vld [vmem:[#allocation12 + $0x138] sm:$0xff] }
  0xea   : > { %2138 = vmatpush1.bf16.msra.mxu0 %v2137_v51  ;;  %v503_v51 = vld [vmem:[#allocation12 + $0x108] sm:$0xff]  ;;  %v2151_v59 = vpack.c.bf16 %v510_v55, %v507_v41  ;;  %v506_v60 = vld [vmem:[#allocation12 + $0x120] sm:$0xff]  ;;  %v516_v57 = vld [vmem:[#allocation12 + $0x170] sm:$0xff] }
  0xeb   : > { %2140 = vmatprep.subr.bf16.mxu0 %v2139_v54  ;;  %v2183_v54 = vpack.c.bf16 %v511_v50, %v508_v46  ;;  %v2149_v62 = vpack.c.bf16 %v503_v51, %v500_v52  ;;  %v806_v48 = vld [vmem:[#allocation15 + $0x8] sm:$0xff]  ;;  %v2153_v0 = vpack.c.bf16 %v509_v43, %v506_v60  ;;  %v512_v46 = vld [vmem:[#allocation12 + $0x150] sm:$0xff]  ;;  %v805_v52 = vld [vmem:[#allocation15] sm:$0xff] }
  0xec   : > { %2174 = vmatpush3.bf16.msra.mxu1 %v2171_v61  ;;  %v517_v61 = vld [vmem:[#allocation12 + $0x178] sm:$0xff]  ;;  %v807_v50 = vld [vmem:[#allocation15 + $0x10] sm:$0xff]  ;;  %v813_v60 = vld [vmem:[#allocation15 + $0x40] sm:$0xff] }
  0xed   : > { %2176 = vmatprep.subr.bf16.mxu1 %v2175_v63  ;;  %v812_v51 = vld [vmem:[#allocation15 + $0x38] sm:$0xff]  ;;  %v815_v55 = vld [vmem:[#allocation15 + $0x50] sm:$0xff]  ;;  %v830_v38 = vld [vmem:[#allocation15 + $0xc8] sm:$0xff] }
  0xee   : > { %2142 = vmatpush1.bf16.msra.mxu0 %v2141_v44  ;;  %v513_v44 = vld [vmem:[#allocation12 + $0x158] sm:$0xff]  ;;  %v2195_v43 = vpack.c.bf16 %v815_v55, %v812_v51  ;;  %v827_v55 = vld [vmem:[#allocation15 + $0xb0] sm:$0xff]  ;;  %v833_v37 = vld [vmem:[#allocation15 + $0xe0] sm:$0xff] }
  0xef   : > { %2144 = vmatprep.subr.bf16.mxu0 %v2143_v56  ;;  %v2187_v56 = vpack.c.bf16 %v517_v61, %v514_v47  ;;  %v2155_v53 = vpack.c.bf16 %v516_v57, %v513_v44  ;;  %v811_v44 = vld [vmem:[#allocation15 + $0x30] sm:$0xff]  ;;  %v814_v57 = vld [vmem:[#allocation15 + $0x48] sm:$0xff]  ;;  %v824_v51 = vld [vmem:[#allocation15 + $0x98] sm:$0xff] }
  0xf0   : > { %2178 = vmatpush3.bf16.msra.mxu1 %v2175_v63  ;;  %v809_v63 = vld [vmem:[#allocation15 + $0x20] sm:$0xff]  ;;  %v836_v34 = vld [vmem:[#allocation15 + $0xf8] sm:$0xff]  ;;  %v839_v42 = vld [vmem:[#allocation15 + $0x110] sm:$0xff] }
  0xf1   : > { %2180 = vmatprep.subr.bf16.mxu1 %v2179_v58  ;;  %v2191_v41 = vpack.c.bf16 %v809_v63, %v806_v48  ;;  %v3320_v48 = vld [vmem:[%s3049_s14 + $0x10] sm:$0xff]  ;;  %v818_v63 = vld [vmem:[#allocation15 + $0x68] sm:$0xff] }
  0xf2   : > { %2146 = vmatpush1.bf16.msra.mxu0 %v2145_v45  ;;  %v515_v45 = vld [vmem:[#allocation12 + $0x168] sm:$0xff]  ;;  %v851_v35 = vld [vmem:[#allocation15 + $0x170] sm:$0xff] }
  0xf3   : > { %2148 = vmatprep.subr.bf16.mxu0 %v2147_v49  ;;  %v810_v49 = vld [vmem:[#allocation15 + $0x28] sm:$0xff]  ;;  %v2157_v47 = vpack.c.bf16 %v515_v45, %v512_v46  ;;  %v819_v45 = vld [vmem:[#allocation15 + $0x70] sm:$0xff] }
  0xf4   : > { %2182 = vmatpush3.bf16.msra.mxu1 %v2179_v58  ;;  %v808_v58 = vld [vmem:[#allocation15 + $0x18] sm:$0xff]  ;;  %v2223_v61 = vpack.c.bf16 %v810_v49, %v807_v50  ;;  %v822_v50 = vld [vmem:[#allocation15 + $0x88] sm:$0xff] }
  0xf5   : > { %2184 = vmatprep.subr.bf16.mxu1 %v2183_v54  ;;  %v3325_v46 = vld [vmem:[%s3049_s14 + $0x18] sm:$0xff] }
  0xf6   : > { %2150 = vmatpush1.bf16.msra.mxu0 %v2149_v62  ;;  %v3317_v62 = vld [vmem:[%s3049_s14 + $0x8] sm:$0xff] }
  0xf7   : > { %2152 = vmatprep.subr.bf16.mxu0 %v2151_v59  ;;  %v2193_v59 = vpack.c.bf16 %v808_v58, %v805_v52  ;;  %v820_v52 = vld [vmem:[#allocation15 + $0x78] sm:$0xff]  ;;  %v3329_v58 = vld [vmem:[%s3049_s14 + $0x20] sm:$0xff]  ;;  %v842_v39 = vld [vmem:[#allocation15 + $0x128] sm:$0xff] }
  0xf8   : > { %2186 = vmatpush3.bf16.msra.mxu1 %v2183_v54  ;;  %v816_v54 = vld [vmem:[#allocation15 + $0x58] sm:$0xff] }
  0xf9   : > { %2188 = vmatprep.subr.bf16.mxu1 %v2187_v56 }
  0xfa   : > { %2154 = vmatpush1.bf16.msra.mxu0 %v2153_v0  ;;  %v821_v0 = vld [vmem:[#allocation15 + $0x80] sm:$0xff] }
  0xfb   : > { %2156 = vmatprep.subr.bf16.mxu0 %v2155_v53  ;;  %v2197_v53 = vpack.c.bf16 %v814_v57, %v811_v44  ;;  %v2199_v49 = vpack.c.bf16 %v821_v0, %v818_v63  ;;  %v828_v44 = vld [vmem:[#allocation15 + $0xb8] sm:$0xff]  ;;  %v2203_v57 = vpack.c.bf16 %v827_v55, %v824_v51  ;;  %v823_v63 = vld [vmem:[#allocation15 + $0x90] sm:$0xff]  ;;  %v829_v51 = vld [vmem:[#allocation15 + $0xc0] sm:$0xff] }
  0xfc   : > { %2190 = vmatpush3.bf16.msra.mxu1 %v2187_v56  ;;  %v2227_v56 = vpack.c.bf16 %v816_v54, %v813_v60  ;;  %v3335_v54 = vld [vmem:[%s3049_s14 + $0x28] sm:$0xff]  ;;  %v3339_v0 = vld [vmem:[%s3049_s14 + $0x30] sm:$0xff]  ;;  %v3349_v55 = vld [vmem:[%s3049_s14 + $0x40] sm:$0xff] }
  0xfd   : > { %2192 = vmatprep.subr.bf16.mxu1 %v2191_v41  ;;  %v817_v41 = vld [vmem:[#allocation15 + $0x60] sm:$0xff] }
  0xfe   : > { %2158 = vmatpush1.bf16.msra.mxu0 %v2157_v47  ;;  %v3818_v47 = vmov 0.0   ;;  %v2201_v60 = vpack.c.bf16 %v820_v52, %v817_v41  ;;  %v834_v41 = vld [vmem:[#allocation15 + $0xe8] sm:$0xff]  ;;  %v2207_v52 = vpack.c.bf16 %v833_v37, %v830_v38  ;;  %v837_v38 = vld [vmem:[#allocation15 + $0x100] sm:$0xff] }
  0xff   : > { %1996 = vmatmul.mubr.f32.vlgmr.msra.gmra.mrb[0].mxu1 %v3317_v62  ;;  %2224 = vmatprep.subr.bf16.mxu0 %v2223_v61  ;;  %v3355_v37 = vld [vmem:[%s3049_s14 + $0x48] sm:$0xff] }
 0x100   : > { %2194 = vmatpush1.bf16.msra.mxu1 %v2193_v59  ;;  %1998 = vmatprep.mubr.f32.mxu1 %v3320_v48  ;;  %v2231_v59 = vpack.c.bf16 %v822_v50, %v819_v45  ;;  %v3345_v50 = vld [vmem:[%s3049_s14 + $0x38] sm:$0xff] }
 0x101   : > { %2196 = vmatprep.subr.bf16.mxu1 %v2195_v43  ;;  %600 = vmatmul.mubr.f32.vlgmr.msra.gmra.mrb[0].mxu0 %v3313_v40  ;;  %v825_v43 = vld [vmem:[#allocation15 + $0xa0] sm:$0xff] }
 0x102   : > { %2226 = vmatpush3.bf16.msra.mxu0 %v2223_v61  ;;  %605 = vmatprep.mubr.f32.mxu0 %v3818_v47  ;;  %v826_v61 = vld [vmem:[#allocation15 + $0xa8] sm:$0xff] }
 0x103   : > { %1999 = vmatmul.mubr.f32.gmra.mrb[2].mxu1 %v3325_v46  ;;  %2228 = vmatprep.subr.bf16.mxu0 %v2227_v56  ;;  %v2205_v45 = vpack.c.bf16 %v826_v61, %v823_v63  ;;  %v835_v63 = vld [vmem:[#allocation15 + $0xf0] sm:$0xff]  ;;  %v838_v61 = vld [vmem:[#allocation15 + $0x108] sm:$0xff] }
 0x104   : > { %2198 = vmatpush1.bf16.msra.mxu1 %v2197_v53  ;;  %2001 = vmatprep.mubr.f32.mxu1 %v3329_v58  ;;  %v2235_v53 = vpack.c.bf16 %v828_v44, %v825_v43  ;;  %v840_v44 = vld [vmem:[#allocation15 + $0x118] sm:$0xff] }
 0x105   : > { %2200 = vmatprep.subr.bf16.mxu1 %v2199_v49  ;;  %606 = vmatmul.mubr.f32.gmra.mrb[2].mxu0 %v3317_v62  ;;  %v831_v49 = vld [vmem:[#allocation15 + $0xd0] sm:$0xff] }
 0x106   : > { %2230 = vmatpush3.bf16.msra.mxu0 %v2227_v56  ;;  %611 = vmatprep.mubr.f32.mxu0 %v3818_v47  ;;  %v832_v56 = vld [vmem:[#allocation15 + $0xd8] sm:$0xff] }
 0x107   : > { %2002 = vmatmul.mubr.f32.gmra.mrb[4].mxu1 %v3335_v54  ;;  %2232 = vmatprep.subr.bf16.mxu0 %v2231_v59  ;;  %v2209_v43 = vpack.c.bf16 %v832_v56, %v829_v51  ;;  %v844_v51 = vld [vmem:[#allocation15 + $0x138] sm:$0xff] }
 0x108   : > { %2202 = vmatpush1.bf16.msra.mxu1 %v2201_v60  ;;  %2004 = vmatprep.mubr.f32.mxu1 %v3339_v0  ;;  %v2239_v60 = vpack.c.bf16 %v834_v41, %v831_v49  ;;  %v2213_v49 = vpack.c.bf16 %v838_v61, %v835_v63  ;;  %v843_v41 = vld [vmem:[#allocation15 + $0x130] sm:$0xff]  ;;  %v848_v56 = vld [vmem:[#allocation15 + $0x158] sm:$0xff] }
 0x109   : > { %2204 = vmatprep.subr.bf16.mxu1 %v2203_v57  ;;  %612 = vmatmul.mubr.f32.gmra.mrb[4].mxu0 %v3320_v48  ;;  %v2211_v57 = vpack.c.bf16 %v839_v42, %v836_v34  ;;  %v841_v42 = vld [vmem:[#allocation15 + $0x120] sm:$0xff]  ;;  %v2219_v63 = vpack.c.bf16 %v851_v35, %v848_v56  ;;  %v847_v61 = vld [vmem:[#allocation15 + $0x150] sm:$0xff]  ;;  %v520_v35 = vlaneseq }
 0x10a   : > { %617 = vmatprep.mubr.f32.mxu0 %v3818_v47  ;;  %2234 = vmatpush3.bf16.msra.mxu0 %v2231_v59  ;;  %v845_v59 = vld [vmem:[#allocation15 + $0x140] sm:$0xff] }
 0x10b   : > { %2005 = vmatmul.mubr.f32.gmra.mrb[6].mxu1 %v3345_v50  ;;  %2236 = vmatprep.subr.bf16.mxu0 %v2235_v53  ;;  %v2215_v34 = vpack.c.bf16 %v845_v59, %v842_v39 }
 0x10c   : > { %2206 = vmatpush1.bf16.msra.mxu1 %v2205_v45  ;;  %2007 = vmatprep.mubr.f32.mxu1 %v3349_v55  ;;  %v2243_v45 = vpack.c.bf16 %v840_v44, %v837_v38  ;;  %v849_v38 = vld [vmem:[#allocation15 + $0x160] sm:$0xff]  ;;  %v852_v44 = vld [vmem:[#allocation15 + $0x178] sm:$0xff] }
 0x10d   : > { %2208 = vmatprep.subr.bf16.mxu1 %v2207_v52  ;;  %618 = vmatmul.mubr.f32.gmra.mrb[6].mxu0 %v3325_v46  ;;  %v846_v52 = vld [vmem:[#allocation15 + $0x148] sm:$0xff]  ;;  %v2251_v39 = vpack.c.bf16 %v852_v44, %v849_v38 }
 0x10e   : > { %623 = vmatprep.mubr.f32.mxu0 %v3818_v47  ;;  %2238 = vmatpush3.bf16.msra.mxu0 %v2235_v53  ;;  %v2247_v53 = vpack.c.bf16 %v846_v52, %v843_v41 }
 0x10f   : > { %2008 = vmatmul.mubr.f32.gmra.mrb[8].mxu1 %v3355_v37  ;;  %2240 = vmatprep.subr.bf16.mxu0 %v2239_v60 }
 0x110   : > { %2210 = vmatpush1.bf16.msra.mxu1 %v2209_v43  ;;  %934 = vmatprep.mubr.f32.mxu1 %v3818_v47  ;;  %v2217_v43 = vpack.c.bf16 %v844_v51, %v841_v42 }
 0x111   : > { %2212 = vmatprep.subr.bf16.mxu1 %v2211_v57  ;;  %624 = vmatmul.mubr.f32.gmra.mrb[8].mxu0 %v3329_v58  ;;  %v850_v57 = vld [vmem:[#allocation15 + $0x168] sm:$0xff] }
 0x112   : > { %629 = vmatprep.mubr.f32.mxu0 %v3818_v47  ;;  %2242 = vmatpush3.bf16.msra.mxu0 %v2239_v60  ;;  %v2221_v59 = vpack.c.bf16 %v850_v57, %v847_v61 }
 0x113   : > { %2244 = vmatprep.subr.bf16.mxu0 %v2243_v45 }
 0x114   : > { %2214 = vmatpush1.bf16.msra.mxu1 %v2213_v49 }
 0x115   : > { %2216 = vmatprep.subr.bf16.mxu1 %v2215_v34  ;;  %630 = vmatmul.mubr.f32.gmra.mrb[10].mxu0 %v3335_v54 }
 0x116   : > { %635 = vmatprep.mubr.f32.mxu0 %v3818_v47  ;;  %2246 = vmatpush3.bf16.msra.mxu0 %v2243_v45 }
 0x117   : > { %2248 = vmatprep.subr.bf16.mxu0 %v2247_v53 }
 0x118   : > { %2218 = vmatpush1.bf16.msra.mxu1 %v2217_v43 }
 0x119   : > { %2220 = vmatprep.subr.bf16.mxu1 %v2219_v63  ;;  %636 = vmatmul.mubr.f32.gmra.mrb[12].mxu0 %v3339_v0 }
 0x11a   : > { %641 = vmatprep.mubr.f32.mxu0 %v3818_v47  ;;  %2250 = vmatpush3.bf16.msra.mxu0 %v2247_v53 }
 0x11b   : > { %2252 = vmatprep.subr.bf16.mxu0 %v2251_v39 }
 0x11c   : > { %2222 = vmatpush1.bf16.msra.mxu1 %v2221_v59 }
 0x11d   : > { %642 = vmatmul.mubr.f32.gmra.mrb[14].mxu0 %v3345_v50 }
 0x11e   : > { %647 = vmatprep.mubr.f32.mxu0 %v3818_v47  ;;  %2254 = vmatpush3.bf16.msra.mxu0 %v2251_v39 }
 0x11f   : > { %935 = vmatmul.mubr.f32.vlgmr.msra.gmra.mrb[10].mxu1 %v3313_v40 }
 0x120   : > { %940 = vmatprep.mubr.f32.mxu1 %v3818_v47 }
 0x121   : > { %648 = vmatmul.mubr.f32.gmra.mrb[16].mxu0 %v3349_v55 }
 0x122   : > { %653 = vmatprep.mubr.f32.mxu0 %v3818_v47 }
 0x123   : > { %941 = vmatmul.mubr.f32.gmra.mrb[12].mxu1 %v3317_v62 }
 0x124   : > { %946 = vmatprep.mubr.f32.mxu1 %v3818_v47 }
 0x125   : > { %654 = vmatmul.mubr.f32.gmra.mrb[18].mxu0 %v3355_v37 }
 0x126   : > { %2042 = vmatprep.mubr.f32.mxu0 %v3313_v40  ;;  %v3401_v40 = vshrl.u32 %v520_v35, 7 }
 0x127   : > { %947 = vmatmul.mubr.f32.gmra.mrb[14].mxu1 %v3320_v48 }
 0x128   : > { %952 = vmatprep.mubr.f32.mxu1 %v3818_v47 }
 0x129   : > { %2043 = vmatmul.mubr.f32.vlgmr.msra.gmra.mrb[20].mxu0 %v3317_v62  ;;  %v530_v62 = vsub.s32 2, %v3401_v40 }
 0x12a   : > { %2045 = vmatprep.mubr.f32.mxu0 %v3320_v48  ;;  %v518_v48 = vld [vmem:[%s3720_s5] sm:$0x7] }
 0x12b   : > { %953 = vmatmul.mubr.f32.gmra.mrb[16].mxu1 %v3325_v46 }
 0x12c   : > { %958 = vmatprep.mubr.f32.mxu1 %v3818_v47 }
 0x12d   : > { %2046 = vmatmul.mubr.f32.gmra.mrb[22].mxu0 %v3325_v46  ;;  %v522_v46 = vsub.s32 0, %v3401_v40 }
 0x12e   : > { %2048 = vmatprep.mubr.f32.mxu0 %v3329_v58 }
 0x12f   : > { %959 = vmatmul.mubr.f32.gmra.mrb[18].mxu1 %v3329_v58  ;;  %v526_v58 = vsub.s32 1, %v3401_v40 }
 0x130   : > { %964 = vmatprep.mubr.f32.mxu1 %v3818_v47 }
 0x131   : > { %2049 = vmatmul.mubr.f32.gmra.mrb[24].mxu0 %v3335_v54 }
 0x132   : > { %2051 = vmatprep.mubr.f32.mxu0 %v3339_v0 }
 0x133   : > { %965 = vmatmul.mubr.f32.gmra.mrb[20].mxu1 %v3335_v54  ;;  %v531_v54 = vrot.slane %v518_v48, %v530_v62 }
 0x134   : > { %970 = vmatprep.mubr.f32.mxu1 %v3818_v47 }
 0x135   : > { %2052 = vmatmul.mubr.f32.gmra.mrb[26].mxu0 %v3345_v50 }
 0x136   : > { %2054 = vmatprep.mubr.f32.mxu0 %v3349_v55 }
 0x137   : > { %971 = vmatmul.mubr.f32.gmra.mrb[22].mxu1 %v3339_v0 }
 0x138   : > { %976 = vmatprep.mubr.f32.mxu1 %v3818_v47 }
 0x139   : > { %2055 = vmatmul.mubr.f32.gmra.mrb[28].mxu0 %v3355_v37 }
 0x13b   : > { %977 = vmatmul.mubr.f32.gmra.mrb[24].mxu1 %v3345_v50  ;;  %v3417_v50 = vrot.slane %v518_v48, %v526_v58 }
 0x13c   : > { %982 = vmatprep.mubr.f32.mxu1 %v3818_v47 }
 0x13f   : > { %983 = vmatmul.mubr.f32.gmra.mrb[26].mxu1 %v3349_v55 }
 0x140   : > { %988 = vmatprep.mubr.f32.mxu1 %v3818_v47  ;;  %v3413_v47 = vrot.slane %v518_v48, %v522_v46 }
 0x143   : > { %989 = vmatmul.mubr.f32.gmra.mrb[28].mxu1 %v3355_v37 }
 0x1d2   : > { %v1997_v0 = vpop.f32.mrb[0].mxu1 }
 0x1d3   : > { %v732_v55 = vadd.f32 %v1997_v0, %v531_v54  ;;  %v726_v60 = vpop.f32.mrb[1].mxu1 }
 0x1d4   : > { %v727_v37 = vadd.f32 %v726_v60, %v531_v54  ;;  %v601_v45 = vpop.f32.mrb[0].mxu0 }
 0x1d5   : > { %780 = vst [vmem:[#allocation2 + $0x28] sm:$0xff] %v732_v55  ;;  %v602_v49 = vadd.f32 %v601_v45, %v3413_v47  ;;  %v603_v41 = vpop.f32.mrb[1].mxu0 }
 0x1d6   : > { %777 = vst [vmem:[#allocation2 + $0x10] sm:$0xff] %v727_v37  ;;  %v604_v52 = vadd.f32 %v603_v41, %v3417_v50  ;;  %v2000_v34 = vpop.f32.mrb[2].mxu1 }
 0x1d7   : > { %775 = vst [vmem:[#allocation2] sm:$0xff] %v602_v49  ;;  %v742_v42 = vadd.f32 %v2000_v34, %v531_v54  ;;  %v736_v51 = vpop.f32.mrb[3].mxu1 }
 0x1d8   : > { %776 = vst [vmem:[#allocation2 + $0x8] sm:$0xff] %v604_v52  ;;  %v607_v56 = vpop.f32.mrb[2].mxu0  ;;  %v737_v53 = vadd.f32 %v736_v51, %v531_v54 }
 0x1d9   : > { %v608_v43 = vadd.f32 %v607_v56, %v3413_v47  ;;  %786 = vst [vmem:[#allocation2 + $0x58] sm:$0xff] %v742_v42  ;;  %v609_v38 = vpop.f32.mrb[3].mxu0 }
 0x1da   : > { %v610_v44 = vadd.f32 %v609_v38, %v3417_v50  ;;  %783 = vst [vmem:[#allocation2 + $0x40] sm:$0xff] %v737_v53  ;;  %v2003_v63 = vpop.f32.mrb[4].mxu1 }
 0x1db   : > { %778 = vst [vmem:[#allocation2 + $0x18] sm:$0xff] %v608_v43  ;;  %v752_v61 = vadd.f32 %v2003_v63, %v531_v54  ;;  %v746_v57 = vpop.f32.mrb[5].mxu1 }
 0x1dc   : > { %779 = vst [vmem:[#allocation2 + $0x20] sm:$0xff] %v610_v44  ;;  %v613_v39 = vpop.f32.mrb[4].mxu0  ;;  %v747_v59 = vadd.f32 %v746_v57, %v531_v54 }
 0x1dd   : > { %v614_v35 = vadd.f32 %v613_v39, %v3413_v47  ;;  %792 = vst [vmem:[#allocation2 + $0x88] sm:$0xff] %v752_v61  ;;  %v615_v48 = vpop.f32.mrb[5].mxu0 }
 0x1de   : > { %v616_v0 = vadd.f32 %v615_v48, %v3417_v50  ;;  %789 = vst [vmem:[#allocation2 + $0x70] sm:$0xff] %v747_v59  ;;  %v2006_v55 = vpop.f32.mrb[6].mxu1 }
 0x1df   : > { %781 = vst [vmem:[#allocation2 + $0x30] sm:$0xff] %v614_v35  ;;  %v762_v60 = vadd.f32 %v2006_v55, %v531_v54  ;;  %v756_v37 = vpop.f32.mrb[7].mxu1 }
 0x1e0   : > { %782 = vst [vmem:[#allocation2 + $0x38] sm:$0xff] %v616_v0  ;;  %v619_v45 = vpop.f32.mrb[6].mxu0  ;;  %v757_v49 = vadd.f32 %v756_v37, %v531_v54 }
 0x1e1   : > { %v620_v41 = vadd.f32 %v619_v45, %v3413_v47  ;;  %798 = vst [vmem:[#allocation2 + $0xb8] sm:$0xff] %v762_v60  ;;  %v621_v52 = vpop.f32.mrb[7].mxu0 }
 0x1e2   : > { %v622_v34 = vadd.f32 %v621_v52, %v3417_v50  ;;  %795 = vst [vmem:[#allocation2 + $0xa0] sm:$0xff] %v757_v49  ;;  %v2009_v42 = vpop.f32.mrb[8].mxu1 }
 0x1e3   : > { %784 = vst [vmem:[#allocation2 + $0x48] sm:$0xff] %v620_v41  ;;  %v772_v51 = vadd.f32 %v2009_v42, %v531_v54  ;;  %v766_v56 = vpop.f32.mrb[9].mxu1 }
 0x1e4   : > { %785 = vst [vmem:[#allocation2 + $0x50] sm:$0xff] %v622_v34  ;;  %v625_v53 = vpop.f32.mrb[8].mxu0  ;;  %v767_v43 = vadd.f32 %v766_v56, %v531_v54  ;;  %v853_v54 = vld [vmem:[%s3819_s18] sm:$0x7] }
 0x1e5   : > { %v626_v38 = vadd.f32 %v625_v53, %v3413_v47  ;;  %804 = vst [vmem:[#allocation2 + $0xe8] sm:$0xff] %v772_v51  ;;  %v627_v44 = vpop.f32.mrb[9].mxu0  ;;  %v3438_v60 = vrot.slane %v853_v54, %v522_v46  ;;  %v3442_v37 = vrot.slane %v853_v54, %v526_v58 }
 0x1e6   : > { %v628_v63 = vadd.f32 %v627_v44, %v3417_v50  ;;  %801 = vst [vmem:[#allocation2 + $0xd0] sm:$0xff] %v767_v43 }
 0x1e7   : > { %787 = vst [vmem:[#allocation2 + $0x60] sm:$0xff] %v626_v38 }
 0x1e8   : > { %788 = vst [vmem:[#allocation2 + $0x68] sm:$0xff] %v628_v63  ;;  %v631_v61 = vpop.f32.mrb[10].mxu0 }
 0x1e9   : > { %v632_v57 = vadd.f32 %v631_v61, %v3413_v47  ;;  %v633_v39 = vpop.f32.mrb[11].mxu0 }
 0x1ea   : > { %v634_v59 = vadd.f32 %v633_v39, %v3417_v50 }
 0x1eb   : > { %790 = vst [vmem:[#allocation2 + $0x78] sm:$0xff] %v632_v57 }
 0x1ec   : > { %791 = vst [vmem:[#allocation2 + $0x80] sm:$0xff] %v634_v59  ;;  %v637_v35 = vpop.f32.mrb[12].mxu0 }
 0x1ed   : > { %v638_v48 = vadd.f32 %v637_v35, %v3413_v47  ;;  %v639_v0 = vpop.f32.mrb[13].mxu0  ;;  %v3455_v35 = vrot.slane %v853_v54, %v530_v62 }
 0x1ee   : > { %v640_v55 = vadd.f32 %v639_v0, %v3417_v50 }
 0x1ef   : > { %793 = vst [vmem:[#allocation2 + $0x90] sm:$0xff] %v638_v48 }
 0x1f0   : > { %794 = vst [vmem:[#allocation2 + $0x98] sm:$0xff] %v640_v55  ;;  %v643_v45 = vpop.f32.mrb[14].mxu0 }
 0x1f1   : > { %v644_v49 = vadd.f32 %v643_v45, %v3413_v47  ;;  %v645_v41 = vpop.f32.mrb[15].mxu0 }
 0x1f2   : > { %v936_v52 = vpop.f32.mrb[10].mxu1  ;;  %v646_v34 = vadd.f32 %v645_v41, %v3417_v50 }
 0x1f3   : > { %v937_v42 = vadd.f32 %v936_v52, %v3438_v60  ;;  %v938_v51 = vpop.f32.mrb[11].mxu1  ;;  %796 = vst [vmem:[#allocation2 + $0xa8] sm:$0xff] %v644_v49 }
 0x1f4   : > { %v939_v46 = vadd.f32 %v938_v51, %v3442_v37  ;;  %797 = vst [vmem:[#allocation2 + $0xb0] sm:$0xff] %v646_v34  ;;  %v649_v56 = vpop.f32.mrb[16].mxu0 }
 0x1f5   : > { %1110 = vst [vmem:[#allocation3] sm:$0xff] %v937_v42  ;;  %v650_v58 = vadd.f32 %v649_v56, %v3413_v47  ;;  %v651_v53 = vpop.f32.mrb[17].mxu0 }
 0x1f6   : > { %1111 = vst [vmem:[#allocation3 + $0x8] sm:$0xff] %v939_v46  ;;  %v942_v43 = vpop.f32.mrb[12].mxu1  ;;  %v652_v38 = vadd.f32 %v651_v53, %v3417_v50 }
 0x1f7   : > { %v943_v44 = vadd.f32 %v942_v43, %v3438_v60  ;;  %v944_v63 = vpop.f32.mrb[13].mxu1  ;;  %799 = vst [vmem:[#allocation2 + $0xc0] sm:$0xff] %v650_v58 }
 0x1f8   : > { %v945_v61 = vadd.f32 %v944_v63, %v3442_v37  ;;  %800 = vst [vmem:[#allocation2 + $0xc8] sm:$0xff] %v652_v38  ;;  %v655_v57 = vpop.f32.mrb[18].mxu0 }
 0x1f9   : > { %1113 = vst [vmem:[#allocation3 + $0x18] sm:$0xff] %v943_v44  ;;  %v656_v39 = vadd.f32 %v655_v57, %v3413_v47  ;;  %v657_v59 = vpop.f32.mrb[19].mxu0 }
 0x1fa   : > { %1114 = vst [vmem:[#allocation3 + $0x20] sm:$0xff] %v945_v61  ;;  %v948_v48 = vpop.f32.mrb[14].mxu1  ;;  %v658_v0 = vadd.f32 %v657_v59, %v3417_v50 }
 0x1fb   : > { %v949_v55 = vadd.f32 %v948_v48, %v3438_v60  ;;  %v950_v45 = vpop.f32.mrb[15].mxu1  ;;  %802 = vst [vmem:[#allocation2 + $0xd8] sm:$0xff] %v656_v39 }
 0x1fc   : > { %v951_v49 = vadd.f32 %v950_v45, %v3442_v37  ;;  %803 = vst [vmem:[#allocation2 + $0xe0] sm:$0xff] %v658_v0  ;;  %v2044_v41 = vpop.f32.mrb[20].mxu0 }
 0x1fd   : > { %1116 = vst [vmem:[#allocation3 + $0x30] sm:$0xff] %v949_v55  ;;  %v1067_v47 = vadd.f32 %v2044_v41, %v3455_v35  ;;  %v1061_v52 = vpop.f32.mrb[21].mxu0 }
 0x1fe   : > { %1117 = vst [vmem:[#allocation3 + $0x38] sm:$0xff] %v951_v49  ;;  %v954_v40 = vpop.f32.mrb[16].mxu1  ;;  %v1062_v62 = vadd.f32 %v1061_v52, %v3455_v35 }
 0x1ff   : > { %v955_v54 = vadd.f32 %v954_v40, %v3438_v60  ;;  %v956_v34 = vpop.f32.mrb[17].mxu1  ;;  %1115 = vst [vmem:[#allocation3 + $0x28] sm:$0xff] %v1067_v47 }
 0x200   : > { %v957_v50 = vadd.f32 %v956_v34, %v3442_v37  ;;  %1112 = vst [vmem:[#allocation3 + $0x10] sm:$0xff] %v1062_v62  ;;  %v2047_v42 = vpop.f32.mrb[22].mxu0 }
 0x201   : > { %1119 = vst [vmem:[#allocation3 + $0x48] sm:$0xff] %v955_v54  ;;  %v1077_v51 = vadd.f32 %v2047_v42, %v3455_v35  ;;  %v1071_v46 = vpop.f32.mrb[23].mxu0 }
 0x202   : > { %1120 = vst [vmem:[#allocation3 + $0x50] sm:$0xff] %v957_v50  ;;  %v960_v56 = vpop.f32.mrb[18].mxu1  ;;  %v1072_v58 = vadd.f32 %v1071_v46, %v3455_v35 }
 0x203   : > { %v961_v53 = vadd.f32 %v960_v56, %v3438_v60  ;;  %v962_v43 = vpop.f32.mrb[19].mxu1  ;;  %1121 = vst [vmem:[#allocation3 + $0x58] sm:$0xff] %v1077_v51 }
 0x204   : > { %v963_v38 = vadd.f32 %v962_v43, %v3442_v37  ;;  %1118 = vst [vmem:[#allocation3 + $0x40] sm:$0xff] %v1072_v58  ;;  %v2050_v44 = vpop.f32.mrb[24].mxu0 }
 0x205   : > { %1122 = vst [vmem:[#allocation3 + $0x60] sm:$0xff] %v961_v53  ;;  %v1087_v63 = vadd.f32 %v2050_v44, %v3455_v35  ;;  %v1081_v61 = vpop.f32.mrb[25].mxu0 }
 0x206   : > { %1123 = vst [vmem:[#allocation3 + $0x68] sm:$0xff] %v963_v38  ;;  %v966_v57 = vpop.f32.mrb[20].mxu1  ;;  %v1082_v39 = vadd.f32 %v1081_v61, %v3455_v35 }
 0x207   : > { %v967_v59 = vadd.f32 %v966_v57, %v3438_v60  ;;  %v968_v48 = vpop.f32.mrb[21].mxu1  ;;  %1127 = vst [vmem:[#allocation3 + $0x88] sm:$0xff] %v1087_v63 }
 0x208   : > { %v969_v0 = vadd.f32 %v968_v48, %v3442_v37  ;;  %1124 = vst [vmem:[#allocation3 + $0x70] sm:$0xff] %v1082_v39  ;;  %v2053_v55 = vpop.f32.mrb[26].mxu0 }
 0x209   : > { %1125 = vst [vmem:[#allocation3 + $0x78] sm:$0xff] %v967_v59  ;;  %v1097_v45 = vadd.f32 %v2053_v55, %v3455_v35  ;;  %v1091_v49 = vpop.f32.mrb[27].mxu0 }
 0x20a   : > { %1126 = vst [vmem:[#allocation3 + $0x80] sm:$0xff] %v969_v0  ;;  %v972_v41 = vpop.f32.mrb[22].mxu1  ;;  %v1092_v47 = vadd.f32 %v1091_v49, %v3455_v35 }
 0x20b   : > { %v973_v52 = vadd.f32 %v972_v41, %v3438_v60  ;;  %v974_v40 = vpop.f32.mrb[23].mxu1  ;;  %1133 = vst [vmem:[#allocation3 + $0xb8] sm:$0xff] %v1097_v45 }
 0x20c   : > { %v975_v62 = vadd.f32 %v974_v40, %v3442_v37  ;;  %1130 = vst [vmem:[#allocation3 + $0xa0] sm:$0xff] %v1092_v47  ;;  %v2056_v54 = vpop.f32.mrb[28].mxu0 }
 0x20d   : > { %1128 = vst [vmem:[#allocation3 + $0x90] sm:$0xff] %v973_v52  ;;  %v1107_v34 = vadd.f32 %v2056_v54, %v3455_v35  ;;  %v1101_v50 = vpop.f32.mrb[29].mxu0 }
 0x20e   : > { %1129 = vst [vmem:[#allocation3 + $0x98] sm:$0xff] %v975_v62  ;;  %v978_v42 = vpop.f32.mrb[24].mxu1  ;;  %v1102_v51 = vadd.f32 %v1101_v50, %v3455_v35 }
 0x20f   : > { %v979_v46 = vadd.f32 %v978_v42, %v3438_v60  ;;  %v980_v56 = vpop.f32.mrb[25].mxu1  ;;  %1139 = vst [vmem:[#allocation3 + $0xe8] sm:$0xff] %v1107_v34 }
 0x210   : > { %v981_v58 = vadd.f32 %v980_v56, %v3442_v37  ;;  %1136 = vst [vmem:[#allocation3 + $0xd0] sm:$0xff] %v1102_v51 }
 0x211   : > { %1131 = vst [vmem:[#allocation3 + $0xa8] sm:$0xff] %v979_v46 }
 0x212   : > { %1132 = vst [vmem:[#allocation3 + $0xb0] sm:$0xff] %v981_v58  ;;  %v984_v53 = vpop.f32.mrb[26].mxu1 }
 0x213   : > { %v985_v43 = vadd.f32 %v984_v53, %v3438_v60  ;;  %v986_v38 = vpop.f32.mrb[27].mxu1 }
 0x214   : > { %v987_v44 = vadd.f32 %v986_v38, %v3442_v37  ;;  %1777 = sbr.rel (%p1860_p10) target bundleno = 866 (0x362), region = 129 }
 0x215   : > { %1134 = vst [vmem:[#allocation3 + $0xc0] sm:$0xff] %v985_v43 }
 0x216   : > { %1135 = vst [vmem:[#allocation3 + $0xc8] sm:$0xff] %v987_v44  ;;  %v990_v63 = vpop.f32.mrb[28].mxu1 }
 0x217   : > { %v991_v35 = vadd.f32 %v990_v63, %v3438_v60  ;;  %v992_v61 = vpop.f32.mrb[29].mxu1 }
 0x218   : > { %v993_v57 = vadd.f32 %v992_v61, %v3442_v37 }
 0x219   : > { %1137 = vst [vmem:[#allocation3 + $0xd8] sm:$0xff] %v991_v35 }
 0x21a   : > { %1138 = vst [vmem:[#allocation3 + $0xe0] sm:$0xff] %v993_v57 }
 0x21b LB: >> { %v2255_v39 = vpack.c.bf16 %v3118_v6, %v3112_v3  ;;  %v2257_v60 = vpack.c.bf16 %v3116_v5, %v3110_v2  ;;  %v2259_v37 = vpack.c.bf16 %v3130_v12, %v3124_v9  ;;  %v2261_v59 = vpack.c.bf16 %v3128_v11, %v3122_v8  ;;  %s1861_s15 = sadd.s32 4294967295, %s3065_s29  ;;  %v3820_v43 = vld [vmem:[#allocation27_spill] sm:$0xff]  ;;  %v3821_v44 = vld [vmem:[#allocation30_spill] sm:$0xff]  ;;  %v3822_v63 = vld [vmem:[#allocation33_spill] sm:$0xff]  ;;  %s1875_s13 = smul.u32 24, %s2737_s17  ;;  %s2737_s17 = sphi %s3485_s17, %s1264_s17  }
 0x21c   : >> { %v2288_v48 = vpack.c.bf16 %v3120_v7, %v3114_v4  ;;  %v2263_v0 = vpack.c.bf16 %v3142_v18, %v3136_v15  ;;  %v2751_v55 = vmov 0.0|0.0   ;;  %v2291_v45 = vpack.c.bf16 %v3132_v13, %v3126_v10  ;;  %s3518_s12 = ssub.s32 %s1861_s15, %s2737_s17  ;;  %v3823_v61 = vld [vmem:[#allocation26_spill] sm:$0xff]  ;;  %v3824_v57 = vld [vmem:[#allocation28_spill] sm:$0xff]  ;;  %s1866_s16 = sshll.u32 %s2737_s17, 3 }
 0x21d   : >> { %2256 = vmatprep.subr.bf16.mxu0 %v2255_v39  ;;  %2287 = vmatprep.subr.bf16.mxu1 %v2751_v55  ;;  %v2752_v49 = vmov 0.0   ;;  %v2265_v41 = vpack.c.bf16 %v3140_v17, %v3134_v14  ;;  %v2267_v47 = vpack.c.bf16 %v3154_v24, %v3148_v21  ;;  %v2294_v52 = vpack.c.bf16 %v3144_v19, %v3138_v16  ;;  %s1413_s9 = scalar_lea.vmem [#allocation2], %s1875_s13  ;;  %s1876_s11 = smul.u32 24, %s3518_s12 }
 0x21e   : >> { %2258 = vmatpush1.bf16.msra.mxu0 %v2257_v60  ;;  %2289 = vmatpush3.bf16.msra.mxu1 %v2288_v48  ;;  %vm2753_vm0 = vmmov 0   ;;  %v2269_v40 = vpack.c.bf16 %v3152_v23, %v3146_v20  ;;  %v2271_v62 = vpack.c.bf16 %v3166_v30, %v3160_v27  ;;  %v2297_v54 = vpack.c.bf16 %v3156_v25, %v3150_v22  ;;  %v3825_v60 = vld [vmem:[#allocation29_spill] sm:$0xff]  ;;  %v3827_v48 = vld [vmem:[#allocation36_spill] sm:$0xff]  ;;  %s1454_s26 = scalar_lea.vmem %s3068_s27, %s1866_s16 [#allocation18]  ;;  %s1871_s14 = sshll.u32 %s3518_s12, 3 }
 0x21f   : >> { %2260 = vmatprep.subr.bf16.mxu0 %v2259_v37  ;;  %1334 = vmatprep.mubr.f32.mxu0 %v2752_v49  ;;  %v2754_v34 = vmov 0   ;;  %v1445_v50 = vstv %s2737_s17  ;;  %v1634_v42 = vstv %s3518_s12  ;;  %v2273_v51 = vpack.c.bf16 %v3164_v29, %v3158_v26  ;;  %v3826_v37 = vld [vmem:[#allocation32_spill] sm:$0xff]  ;;  %s3627_s19 = scalar_lea.vmem [#allocation3], %s1876_s11  ;;  %s1643_s20 = scalar_lea.vmem [#allocation4], %s1871_s14 }
 0x220   : >> { %2290 = vmatprep.subr.bf16.mxu1 %v2751_v55  ;;  %2089 = vmatprep.mubr.msk.f32.mxu1 %vm2753_vm0, %v2752_v49  ;;  %vm1446_vm1 = vcmp.lt.s32.totalorder %v1445_v50, %v3108_v1  ;;  %vm1635_vm2 = vcmp.lt.s32.totalorder %v1634_v42, %v3108_v1  ;;  %v2275_v56 = vpack.c.bf16 %v3178_v36, %v3172_v33  ;;  %v3834_v50 = vld [vmem:[#allocation45_spill] sm:$0xff]  ;;  %s1264_s17 = sadd.s32 1, %s2737_s17  }
 0x221   : >> { %2478 = vset.pattern.permute.xlu0 %v2754_v34  ;;  %v1447_v46 = vsel %vm1446_vm1, 1, %v2754_v34  ;;  %v2300_v58 = vpack.c.bf16 %v3168_v31, %v3162_v28  ;;  %v1636_v53 = vsel %vm1635_vm2, 1, %v2754_v34  ;;  %v2277_v38 = vpack.c.bf16 %v3820_v43, %v3170_v32  ;;  %v3833_v34 = vld [vmem:[#allocation42_spill] sm:$0xff]  ;;  %v3838_v43 = vld [vmem:[#allocation44_spill] sm:$0xff]  ;;  %p1263_p12 = scmp.ge.s32.totalorder %s1264_s17, %s3065_s29 }
 0x222   : >> { %2262 = vmatpush1.bf16.msra.mxu0 %v2261_v59  ;;  %2292 = vmatpush3.bf16.msra.mxu1 %v2291_v45  ;;  %v2279_v35 = vpack.c.bf16 %v3822_v63, %v3821_v44  ;;  %v2303_v39 = vpack.c.bf16 %v3824_v57, %v3823_v61  ;;  %v2281_v59 = vpack.c.bf16 %v3826_v37, %v3825_v60  ;;  %v3839_v44 = vld [vmem:[#allocation48_spill] sm:$0xff]  ;;  %v3840_v63 = vld [vmem:[#allocation51_spill] sm:$0xff]  ;;  %v3842_v57 = vld [vmem:[#allocation46_spill] sm:$0xff] }
 0x223   : >> { %2264 = vmatprep.subr.bf16.mxu0 %v2263_v0  ;;  %2293 = vmatprep.subr.bf16.mxu1 %v2751_v55  ;;  %v3828_v0 = vld [vmem:[#allocation39_spill] sm:$0xff]  ;;  %v2311_v42 = vpack.c.bf16 %v3834_v50, %v3833_v34  ;;  %v3844_v37 = vld [vmem:[#allocation50_spill] sm:$0xff]  ;;  %v3851_v34 = vld [vmem:[#allocation60_spill] sm:$0xff] }
 0x224   : >> { %1449 = vperm.xlu0 %2478, %v1447_v46   ;;  %v2283_v45 = vpack.c.bf16 %v3828_v0, %v3827_v48  ;;  %v3836_v46 = vld [vmem:[#allocation40_spill] sm:$0xff]  ;;  %v3841_v61 = vld [vmem:[#allocation43_spill] sm:$0xff]  ;;  %v3845_v48 = vld [vmem:[#allocation54_spill] sm:$0xff] }
 0x225   : >> { %v3843_v60 = vld [vmem:[#allocation47_spill] sm:$0xff]  ;;  %v3846_v0 = vld [vmem:[#allocation57_spill] sm:$0xff] }
 0x226   : >> { %2266 = vmatpush1.bf16.msra.mxu0 %v2265_v41  ;;  %2295 = vmatpush3.bf16.msra.mxu1 %v2294_v52  ;;  %v3829_v41 = vld [vmem:[#allocation31_spill] sm:$0xff] }
 0x227   : >> { %2268 = vmatprep.subr.bf16.mxu0 %v2267_v47  ;;  %2296 = vmatprep.subr.bf16.mxu1 %v2751_v55  ;;  %v3830_v47 = vld [vmem:[#allocation34_spill] sm:$0xff]  ;;  %v3852_v50 = vld [vmem:[#allocation63_spill] sm:$0xff] }
 0x228   : >> { %1638 = vperm.xlu0 %2478, %v1636_v53   ;;  %v2306_v52 = vpack.c.bf16 %v3830_v47, %v3829_v41  ;;  %v3837_v53 = vld [vmem:[#allocation41_spill] sm:$0xff]  ;;  %v3848_v47 = vld [vmem:[#allocation52_spill] sm:$0xff] }
 0x229   : >> { %v3847_v41 = vld [vmem:[#allocation49_spill] sm:$0xff] }
 0x22a   : >> { %2270 = vmatpush1.bf16.msra.mxu0 %v2269_v40  ;;  %2298 = vmatpush3.bf16.msra.mxu1 %v2297_v54  ;;  %v3831_v40 = vld [vmem:[#allocation35_spill] sm:$0xff] }
 0x22b   : >> { %2272 = vmatprep.subr.bf16.mxu0 %v2271_v62  ;;  %2299 = vmatprep.subr.bf16.mxu1 %v2751_v55  ;;  %v3832_v62 = vld [vmem:[#allocation38_spill] sm:$0xff] }
 0x22c   : >> { %v2285_v54 = vpack.c.bf16 %v3832_v62, %v3831_v40  ;;  %v3849_v40 = vld [vmem:[#allocation53_spill] sm:$0xff]  ;;  %v3850_v62 = vld [vmem:[#allocation56_spill] sm:$0xff] }
 0x22e   : >> { %2274 = vmatpush1.bf16.msra.mxu0 %v2273_v51  ;;  %2301 = vmatpush3.bf16.msra.mxu1 %v2300_v58  ;;  %v3835_v51 = vld [vmem:[#allocation37_spill] sm:$0xff]  ;;  %v3559_v58 = vld [vmem:[#allocation5] sm:$0xff] }
 0x22f   : >> { %2276 = vmatprep.subr.bf16.mxu0 %v2275_v56  ;;  %2302 = vmatprep.subr.bf16.mxu1 %v2751_v55  ;;  %v2309_v56 = vpack.c.bf16 %v3836_v46, %v3835_v51  ;;  %v3853_v51 = vld [vmem:[#allocation55_spill] sm:$0xff]  ;;  %v3854_v46 = vld [vmem:[#allocation58_spill] sm:$0xff] }
 0x232   : >> { %2278 = vmatpush1.bf16.msra.mxu0 %v2277_v38  ;;  %2304 = vmatpush3.bf16.msra.mxu1 %v2303_v39  ;;  %v2313_v38 = vpack.c.bf16 %v3838_v43, %v3837_v53  ;;  %v2344_v39 = vpack.c.bf16 %v3842_v57, %v3841_v61  ;;  %v3855_v53 = vld [vmem:[#allocation59_spill] sm:$0xff]  ;;  %v3856_v43 = vld [vmem:[#allocation62_spill] sm:$0xff]  ;;  %v3860_v61 = vld [vmem:[#allocation64_spill] sm:$0xff] }
 0x233   : >> { %2280 = vmatprep.subr.bf16.mxu0 %v2279_v35  ;;  %2305 = vmatprep.subr.bf16.mxu1 %v2751_v55  ;;  %v2315_v35 = vpack.c.bf16 %v3840_v63, %v3839_v44  ;;  %v3858_v44 = vld [vmem:[#allocation69_spill] sm:$0xff] }
 0x236   : >> { %2282 = vmatpush1.bf16.msra.mxu0 %v2281_v59  ;;  %2307 = vmatpush3.bf16.msra.mxu1 %v2306_v52  ;;  %v2317_v59 = vpack.c.bf16 %v3844_v37, %v3843_v60  ;;  %v2347_v52 = vpack.c.bf16 %v3848_v47, %v3847_v41  ;;  %v3862_v60 = vld [vmem:[#allocation68_spill] sm:$0xff]  ;;  %v3866_v41 = vld [vmem:[#allocation70_spill] sm:$0xff] }
 0x237   : >> { %2284 = vmatprep.subr.bf16.mxu0 %v2283_v45  ;;  %2308 = vmatprep.subr.bf16.mxu1 %v2751_v55  ;;  %v2319_v45 = vpack.c.bf16 %v3846_v0, %v3845_v48  ;;  %v3864_v48 = vld [vmem:[#allocation75_spill] sm:$0xff] }
 0x23a   : >> { %2286 = vmatpush1.bf16.msra.mxu0 %v2285_v54  ;;  %2310 = vmatpush3.bf16.msra.mxu1 %v2309_v56  ;;  %v2321_v54 = vpack.c.bf16 %v3850_v62, %v3849_v40  ;;  %v2350_v56 = vpack.c.bf16 %v3854_v46, %v3853_v51  ;;  %v3868_v40 = vld [vmem:[#allocation74_spill] sm:$0xff]  ;;  %v3872_v51 = vld [vmem:[#allocation76_spill] sm:$0xff] }
 0x23b   : >> { %2312 = vmatprep.subr.bf16.mxu0 %v2311_v42  ;;  %2343 = vmatprep.subr.bf16.mxu1 %v2751_v55  ;;  %v2323_v42 = vpack.c.bf16 %v3852_v50, %v3851_v34  ;;  %v3870_v34 = vld [vmem:[#allocation81_spill] sm:$0xff] }
 0x23d   : >> { %1335 = vmatmul.mubr.f32.vlgmr.msra.gmra.mrb[0].mxu0 %v3559_v58  ;;  %2090 = vmatmul.mubr.f32.vlgmr.msra.gmra.mrb[0].mxu1 %v3559_v58 }
 0x23e   : >> { %2314 = vmatpush1.bf16.msra.mxu0 %v2313_v38  ;;  %1523 = vmatprep.mubr.f32.mxu0 %v2752_v49  ;;  %v3857_v38 = vld [vmem:[#allocation66_spill] sm:$0xff] }
 0x23f   : >> { %2316 = vmatprep.subr.bf16.mxu0 %v2315_v35  ;;  %2345 = vmatpush3.bf16.msra.mxu1 %v2344_v39  ;;  %v2327_v63 = vpack.c.bf16 %v3858_v44, %v3857_v38  ;;  %v3859_v35 = vld [vmem:[#allocation61_spill] sm:$0xff]  ;;  %v3876_v38 = vld [vmem:[#allocation87_spill] sm:$0xff] }
 0x240   : >> { %2124 = vmatprep.mubr.msk.f32.mxu1 %vm2753_vm0, %v2752_v49  ;;  %2346 = vmatprep.subr.bf16.mxu1 %v2751_v55  ;;  %v2325_v49 = vpack.c.bf16 %v3856_v43, %v3855_v53  ;;  %v2353_v57 = vpack.c.bf16 %v3860_v61, %v3859_v35  ;;  %v3861_v39 = vld [vmem:[#allocation65_spill] sm:$0xff]  ;;  %v3874_v53 = vld [vmem:[#allocation80_spill] sm:$0xff]  ;;  %v3878_v35 = vld [vmem:[#allocation82_spill] sm:$0xff] }
 0x241   : >> { %v2329_v37 = vpack.c.bf16 %v3862_v60, %v3861_v39  ;;  %v3880_v39 = vld [vmem:[#allocation86_spill] sm:$0xff] }
 0x242   : >> { %2318 = vmatpush1.bf16.msra.mxu0 %v2317_v59  ;;  %v3863_v59 = vld [vmem:[#allocation72_spill] sm:$0xff] }
 0x243   : >> { %2320 = vmatprep.subr.bf16.mxu0 %v2319_v45  ;;  %2348 = vmatpush3.bf16.msra.mxu1 %v2347_v52  ;;  %v2331_v0 = vpack.c.bf16 %v3864_v48, %v3863_v59  ;;  %v3865_v45 = vld [vmem:[#allocation67_spill] sm:$0xff]  ;;  %v3882_v59 = vld [vmem:[#allocation88_spill] sm:$0xff] }
 0x244   : >> { %2349 = vmatprep.subr.bf16.mxu1 %v2751_v55  ;;  %v2356_v47 = vpack.c.bf16 %v3866_v41, %v3865_v45  ;;  %v3867_v52 = vld [vmem:[#allocation71_spill] sm:$0xff]  ;;  %v1414_v45 = vld [vmem:[%s1413_s9] sm:$0xff] }
 0x245   : >> { %v2333_v62 = vpack.c.bf16 %v3868_v40, %v3867_v52  ;;  %v1415_v40 = vld [vmem:[%s1413_s9 + $0x8] sm:$0xff] }
 0x246   : >> { %2322 = vmatpush1.bf16.msra.mxu0 %v2321_v54  ;;  %v3869_v54 = vld [vmem:[#allocation78_spill] sm:$0xff] }
 0x247   : >> { %2324 = vmatprep.subr.bf16.mxu0 %v2323_v42  ;;  %2351 = vmatpush3.bf16.msra.mxu1 %v2350_v56  ;;  %v2335_v50 = vpack.c.bf16 %v3870_v34, %v3869_v54  ;;  %v3871_v42 = vld [vmem:[#allocation73_spill] sm:$0xff] }
 0x248   : >> { %2352 = vmatprep.subr.bf16.mxu1 %v2751_v55  ;;  %v2359_v46 = vpack.c.bf16 %v3872_v51, %v3871_v42  ;;  %v3873_v56 = vld [vmem:[#allocation77_spill] sm:$0xff] }
 0x249   : >> { %v2337_v43 = vpack.c.bf16 %v3874_v53, %v3873_v56  ;;  %v3883_v53 = vld [vmem:[#allocation89_spill] sm:$0xff] }
 0x24a   : >> { %2326 = vmatpush1.bf16.msra.mxu0 %v2325_v49  ;;  %v3875_v49 = vld [vmem:[#allocation84_spill] sm:$0xff] }
 0x24b   : >> { %2328 = vmatprep.subr.bf16.mxu0 %v2327_v63  ;;  %2354 = vmatpush3.bf16.msra.mxu1 %v2353_v57  ;;  %v2339_v44 = vpack.c.bf16 %v3876_v38, %v3875_v49  ;;  %v3877_v63 = vld [vmem:[#allocation79_spill] sm:$0xff]  ;;  %v1416_v38 = vld [vmem:[%s1413_s9 + $0x10] sm:$0xff] }
 0x24c   : >> { %2355 = vmatprep.subr.bf16.mxu1 %v2751_v55  ;;  %v2362_v61 = vpack.c.bf16 %v3878_v35, %v3877_v63  ;;  %v3879_v57 = vld [vmem:[#allocation83_spill] sm:$0xff]  ;;  %v1603_v63 = vld [vmem:[%s3627_s19] sm:$0xff] }
 0x24d   : >> { %v2341_v60 = vpack.c.bf16 %v3880_v39, %v3879_v57 }
 0x24e   : >> { %2330 = vmatpush1.bf16.msra.mxu0 %v2329_v37  ;;  %v3881_v37 = vld [vmem:[#allocation85_spill] sm:$0xff] }
 0x24f   : >> { %2332 = vmatprep.subr.bf16.mxu0 %v2331_v0  ;;  %2357 = vmatpush3.bf16.msra.mxu1 %v2356_v47  ;;  %v2365_v48 = vpack.c.bf16 %v3882_v59, %v3881_v37  ;;  %v3620_v0 = vld [vmem:[#allocation6] sm:$0xff] }
 0x250   : >> { %2358 = vmatprep.subr.bf16.mxu1 %v2751_v55 }
 0x252   : >> { %2334 = vmatpush1.bf16.msra.mxu0 %v2333_v62 }
 0x253   : >> { %2336 = vmatprep.subr.bf16.mxu0 %v2335_v50  ;;  %2360 = vmatpush3.bf16.msra.mxu1 %v2359_v46 }
 0x254   : >> { %2361 = vmatprep.subr.bf16.mxu1 %v2751_v55 }
 0x256   : >> { %2338 = vmatpush1.bf16.msra.mxu0 %v2337_v43 }
 0x257   : >> { %2340 = vmatprep.subr.bf16.mxu0 %v2339_v44  ;;  %2363 = vmatpush3.bf16.msra.mxu1 %v2362_v61 }
 0x258   : >> { %2364 = vmatprep.subr.bf16.mxu1 %v2751_v55 }
 0x25a   : >> { %2342 = vmatpush1.bf16.msra.mxu0 %v2341_v60  ;;  %v1604_v60 = vld [vmem:[%s3627_s19 + $0x8] sm:$0xff] }
 0x25b   : >> { %2366 = vmatpush3.bf16.msra.mxu1 %v2365_v48 }
 0x25d   : >> { %1524 = vmatmul.mubr.f32.vlgmr.msra.gmra.mrb[2].mxu0 %v3620_v0 }
 0x25e   : >> { %2125 = vmatmul.mubr.f32.vlgmr.msra.gmra.mrb[2].mxu1 %v3620_v0 }
 0x310   : >> { %v1336_v41 = vpop.f32.mrb[0].mxu0  ;;  %v1407_v62 = vpop.f32.mrb[0].mxu1 }
 0x311   : >> { %v1417_v47 = vadd.f32 %v1414_v45, %v1336_v41  ;;  %v1338_v52 = vpop.f32.mrb[1].mxu0  ;;  %v2091_v34 = vpop.f32.mrb[1].mxu1  ;;  %v1437_v43 = vadd.f32 %v3883_v53, %v1407_v62 }
 0x312   : >> { %v1424_v55 = vadd.f32 %v1415_v40, %v1338_v52  ;;  %v1450_v52 = vpop.permute.xlu0 %1449 }
 0x313   : >> { %v1863_v54 = vmul.f32 -1.442695, %v1417_v47  ;;  %vm1451_vm3 = vcmp.eq.s32.totalorder %v1450_v52, 1 }
 0x314   : >> { %v1864_v50 = vmul.f32 -1.442695, %v1424_v55 }
 0x315   : >> { %2479 = vpow2.f32 %v1863_v54 }
 0x316   : >> { %2481 = vpow2.f32 %v1864_v50 }
 0x31f   : >> { %v2480_v42 = vpop.eup %2479 }
 0x320   : >> { %v1421_v51 = vadd.f32 1.0, %v2480_v42  ;;  %v2482_v46 = vpop.eup %2481 }
 0x321   : >> { %v1428_v56 = vadd.f32 1.0, %v2482_v46 }
 0x322   : >> { %2483 = vrcp.f32 %v1421_v51 }
 0x323   : >> { %2485 = vrcp.f32 %v1428_v56 }
 0x32c   : >> { %v2484_v49 = vpop.eup %2483 }
 0x32d   : >> { %v1438_v44 = vmul.f32 %v2484_v49, %v1437_v43  ;;  %v2486_v41 = vpop.eup %2485  ;;  %v3884_v43 = vld [vmem:[#allocation90_spill] sm:$0xff] }
 0x32e   : >> { %v1441_v40 = vsub.f32 1.0, %v2486_v41  ;;  %v1443_v34 = vmul.f32 %v2486_v41, %v3559_v58 }
 0x32f   : >> { %v1439_v35 = vadd.f32 %v1438_v44, %v1416_v38  ;;  %v1605_v44 = vld [vmem:[%s3627_s19 + $0x10] sm:$0xff] }
 0x330   : >> { %v1525_v61 = vpop.f32.mrb[2].mxu0 }
 0x331   : >> { %2487 = vtanh.f32 %v1439_v35  ;;  %v1606_v57 = vadd.f32 %v1603_v63, %v1525_v61  ;;  %v1527_v39 = vpop.f32.mrb[3].mxu0  ;;  %v1596_v37 = vpop.f32.mrb[2].mxu1 }
 0x332   : >> { %v2126_v48 = vpop.f32.mrb[3].mxu1  ;;  %v1613_v45 = vadd.f32 %v1604_v60, %v1527_v39  ;;  %v1626_v49 = vadd.f32 %v3884_v43, %v1596_v37  ;;  %v1639_v60 = vpop.permute.xlu0 %1638 }
 0x333   : >> { %v1868_v59 = vmul.f32 -1.442695, %v1606_v57  ;;  %vm1640_vm4 = vcmp.eq.s32.totalorder %v1639_v60, 1 }
 0x334   : >> { %v1869_v47 = vmul.f32 -1.442695, %v1613_v45 }
 0x335   : >> { %2489 = vpow2.f32 %v1868_v59 }
 0x336   : >> { %2491 = vpow2.f32 %v1869_v47 }
 0x33b   : >> { %v2488_v62 = vpop.eup %2487 }
 0x33c   : >> { %v1442_v54 = vmul.f32 %v2488_v62, %v1441_v40 }
 0x33e   : >> { %v1444_v55 = vadd.f32 %v1443_v34, %v1442_v54 }
 0x33f   : >> { %v2490_v50 = vpop.eup %2489 }
 0x340   : >> { %v1610_v42 = vadd.f32 1.0, %v2490_v50  ;;  %v1452_v51 = vsel %vm1451_vm3, %v1444_v55, 0.0  ;;  %v1456_v46 = vsel %vm1451_vm3, %v1444_v55, %v3559_v58  ;;  %v2492_v56 = vpop.eup %2491 }
 0x341   : >> { %1455 = vst [vmem:[%s1454_s26] sm:$0xff] %v1452_v51  ;;  %1457 = vst [vmem:[#allocation5] sm:$0xff] %v1456_v46  ;;  %v1617_v53 = vadd.f32 1.0, %v2492_v56 }
 0x342   : >> { %2493 = vrcp.f32 %v1610_v42 }
 0x343   : >> { %2495 = vrcp.f32 %v1617_v53 }
 0x34c   : >> { %v2494_v38 = vpop.eup %2493 }
 0x34d   : >> { %v1627_v63 = vmul.f32 %v2494_v38, %v1626_v49  ;;  %v2496_v61 = vpop.eup %2495 }
 0x34e   : >> { %v1630_v57 = vsub.f32 1.0, %v2496_v61  ;;  %v1632_v59 = vmul.f32 %v2496_v61, %v3620_v0 }
 0x34f   : >> { %v1628_v35 = vadd.f32 %v1627_v63, %v1605_v44 }
 0x351   : >> { %2497 = vtanh.f32 %v1628_v35 }
 0x35b   : >> { %v2498_v39 = vpop.eup %2497  ;;  %1266 = sbr.rel (!%p1263_p12) target bundleno = 539 (0x21b), region = 135 }
 0x35c   : >> { %v1631_v58 = vmul.f32 %v2498_v39, %v1630_v57 }
 0x35e   : >> { %v1633_v48 = vadd.f32 %v1632_v59, %v1631_v58 }
 0x360   : >> { %v1641_v45 = vsel %vm1640_vm4, %v1633_v48, 0.0  ;;  %v1645_v41 = vsel %vm1640_vm4, %v1633_v48, %v3620_v0 }
 0x361   : >> { %1644 = vst [vmem:[%s1643_s20] sm:$0xff] %v1641_v45  ;;  %1646 = vst [vmem:[#allocation6] sm:$0xff] %v1645_v41 }
 0x362 PF: > { %v1647_v37 = vld [vmem:[%s3068_s27] sm:$0xff]  ;;  %v1648_v0 = vld [vmem:[%s3068_s27 + $0x8] sm:$0xff]  ;;  %v1649_v62 = vld [vmem:[%s3068_s27 + $0x10] sm:$0xff]  ;;  %s1872_s29 = sshll.u32 %s2843_s25, 7  ;;  %s1710_s18 = sshll.u32 %s3068_s27, 4  ;;  %s3667_s18 = int_to_ptr.vmem [resolvable:$true] %s1710_s18 }
 0x363   : > { %v1650_v50 = vld [vmem:[%s3068_s27 + $0x18] sm:$0xff]  ;;  %v1651_v2 = vld [vmem:[%s3068_s27 + $0x20] sm:$0xff]  ;;  %v1652_v6 = vld [vmem:[%s3068_s27 + $0x28] sm:$0xff]  ;;  %s3885_s15 = sld [smem:[#allocation92_spill]]  ;;  %s1698_s13 = scalar_lea.sflag [#allocation11], %s3045_s0 }
 0x364   : > { %v1653_v12 = vld [vmem:[%s3068_s27 + $0x30] sm:$0xff]  ;;  %v1654_v14 = vld [vmem:[%s3068_s27 + $0x38] sm:$0xff]  ;;  %v1655_v18 = vld [vmem:[%s3068_s27 + $0x40] sm:$0xff]  ;;  %s2653_s9 = scalar_lea.vmem %s3667_s18, 1280  ;;  %s2755_s11 = smov [#allocation18]  }
 0x365   : > { %v1656_v24 = vld [vmem:[%s3068_s27 + $0x48] sm:$0xff]  ;;  %p2654_p3 = scmp.ne.s32.totalorder %s3667_s18, %s2653_s9  ;;  %s2657_s19 = sshll.u32 %s2755_s11, 4  ;;  %s2658_s19 = int_to_ptr.vmem [resolvable:$false] %s2657_s19 }
 0x366   : > { %s2659_s16 = scalar_lea.vmem %s2658_s19, 2560  ;;  %p2660_p4 = scmp.lt.s32.totalorder %s3667_s18, %s2658_s19 }
 0x367   : > { %p2655_p6 = pnand %p2654_p3, %p2993_p1  ;;  %p2661_p0 = scmp.lt.s32.totalorder %s2659_s16, %s2653_s9 }
 0x368   : > { %v1657_v47 = vld [vmem:[#allocation4] sm:$0xff]  ;;  %v1658_v40 = vld [vmem:[#allocation4 + $0x8] sm:$0xff]  ;;  %v1659_v54 = vld [vmem:[#allocation4 + $0x10] sm:$0xff] }
 0x369   : > { %v1667_v52 = vadd.f32 %v1657_v47, %v1647_v37  ;;  %v1668_v34 = vadd.f32 %v1658_v40, %v1648_v0  ;;  %v1669_v55 = vadd.f32 %v1659_v54, %v1649_v62  ;;  %v1660_v1 = vld [vmem:[#allocation4 + $0x18] sm:$0xff]  ;;  %v1661_v5 = vld [vmem:[#allocation4 + $0x20] sm:$0xff]  ;;  %v1662_v7 = vld [vmem:[#allocation4 + $0x28] sm:$0xff]  ;;  %s3663_s12 = scalar_lea.hbm %s3885_s15, %s1872_s29  ;;  %p2656_p7 = pneg %p2655_p6 }
 0x36a   : > { %v1670_v4 = vadd.f32 %v1660_v1, %v1650_v50  ;;  %v1671_v10 = vadd.f32 %v1661_v5, %v1651_v2  ;;  %v1672_v11 = vadd.f32 %v1662_v7, %v1652_v6  ;;  %v1663_v13 = vld [vmem:[#allocation4 + $0x30] sm:$0xff]  ;;  %v1664_v17 = vld [vmem:[#allocation4 + $0x38] sm:$0xff]  ;;  %v1665_v19 = vld [vmem:[#allocation4 + $0x40] sm:$0xff]  ;;  %p2662_p5 = por %p2661_p0, %p2660_p4 }
 0x36b   : > { %v1677_v3 = vmul.f32 0.5, %v1667_v52  ;;  %v1678_v8 = vmul.f32 0.5, %v1668_v34  ;;  %v1679_v9 = vmul.f32 0.5, %v1669_v55  ;;  %v1673_v16 = vadd.f32 %v1663_v13, %v1653_v12  ;;  %v1666_v25 = vld [vmem:[#allocation4 + $0x48] sm:$0xff] }
 0x36c   : > { %v1680_v15 = vmul.f32 0.5, %v1670_v4  ;;  %v1681_v20 = vmul.f32 0.5, %v1671_v10  ;;  %v1682_v21 = vmul.f32 0.5, %v1672_v11  ;;  %v1674_v22 = vadd.f32 %v1664_v17, %v1654_v14  ;;  %p2663_p2 = pnand %p2662_p5, %p2656_p7 }
 0x36d   : > { %1687 = vst [vmem:[%s3068_s27] sm:$0xff] %v1677_v3  ;;  %1688 = vst [vmem:[%s3068_s27 + $0x8] sm:$0xff] %v1678_v8  ;;  %v1675_v23 = vadd.f32 %v1665_v19, %v1655_v18  ;;  %v1683_v26 = vmul.f32 0.5, %v1673_v16  ;;  %v1676_v27 = vadd.f32 %v1666_v25, %v1656_v24 }
 0x36e   : > { %1689 = vst [vmem:[%s3068_s27 + $0x10] sm:$0xff] %v1679_v9  ;;  %1690 = vst [vmem:[%s3068_s27 + $0x18] sm:$0xff] %v1680_v15  ;;  %v1684_v28 = vmul.f32 0.5, %v1674_v22 }
 0x36f   : > { %1691 = vst [vmem:[%s3068_s27 + $0x20] sm:$0xff] %v1681_v20  ;;  %1692 = vst [vmem:[%s3068_s27 + $0x28] sm:$0xff] %v1682_v21  ;;  %v1685_v29 = vmul.f32 0.5, %v1675_v23  ;;  %v1686_v30 = vmul.f32 0.5, %v1676_v27 }
 0x370   : > { %1693 = vst [vmem:[%s3068_s27 + $0x30] sm:$0xff] %v1683_v26  ;;  %1694 = vst [vmem:[%s3068_s27 + $0x38] sm:$0xff] %v1684_v28 }
 0x371   : > { %1695 = vst [vmem:[%s3068_s27 + $0x40] sm:$0xff] %v1685_v29  ;;  %1696 = vst [vmem:[%s3068_s27 + $0x48] sm:$0xff] %v1686_v30 }
 0x372   : > { %2666 = shalt.err (!%p2663_p2)
}
 0x373   : > { %s2667_s27 = scalar_lea.hbm %s3663_s12, 1280  ;;  %s2671_s20 = scalar_lea.hbm %s3885_s15, 2560 }
 0x374   : > { %p2668_p9 = scmp.ne.s32.totalorder %s3663_s12, %s2667_s27  ;;  %p2672_p8 = scmp.lt.u32.totalorder %s3663_s12, %s3885_s15 }
 0x375   : > { %p2673_p10 = scmp.lt.u32.totalorder %s2671_s20, %s2667_s27  ;;  %p2675_p3 = scmp.lt.u32.totalorder %s2667_s27, %s3663_s12 }
 0x376   : > { %p2669_p13 = pnand %p2668_p9, %p2993_p1 }
 0x377   : > { %p2674_p12 = por %p2673_p10, %p2672_p8 }
 0x378   : > { %p2670_p11 = pneg %p2669_p13 }
 0x379   : > { %p2676_p6 = por %p2675_p3, %p2674_p12 }
 0x37b   : > { %p2677_p7 = pnand %p2676_p6, %p2670_p11 }
 0x37d   : > { %2680 = shalt.err (!%p2677_p7)
}
 0x37e   : > { %s2756_s17 = smov 128   ;;  %s2757_s9 = smov 256  }
 0x37f   : > { %s2758_s11 = smov 8  }
 0x380   : > { %2387 = dma.vmem_to_hbm [thread:$0]  (%p2993_p1), %s3667_s18, 1280, %s3663_s12, %s1698_s13, %s2756_s17, %s2757_s9, %s2758_s11  }
 0x381 PF: > { %s3886_s19 = sld [smem:[#allocation24_spill]]  ;;  %s3887_s16 = sld [smem:[#allocation25_spill]] }
 0x382   : > { %p3889_p0 = scmp.ge.s32.totalorder %s2733_s24, 2 }
 0x387   : > { %s1725_s26 = sand.u32 1, %s3886_s19   ;;  %p3888_p4 = scmp.ne.s32.totalorder %s3887_s16, 0 }
 0x388   : > { %s1726_s27 = scalar_lea.sflag [#allocation11], %s1725_s26 }
 0x389   : > { %p2407_p5 = pnand %p3889_p0, %p3888_p4 }
 0x38b   : > { %2716 = dma.done.wait (!%p2407_p5), %s1726_s27, 1280  }
 0x38c   : > { %2718 = vsyncadd (!%p2407_p5), %s1726_s27, 4294966016  ;;  %p32_p2 = scmp.ge.s32.totalorder %s2983_s30, 4   ;;  %s3890_s0 = smov %s2725_s22 }
 0x38d   : > { %s3891_s22 = smov %s2729_s23  ;;  %s3892_s23 = smov %s2999_s21 }
 0x38e   : > { %s3893_s24 = smov %s2983_s30  ;;  %34 = sbr.rel (!%p32_p2) target bundleno = 23 (0x17), region = 146 }
 0x395   :  { %1731 = vsyncpa [#allocation10], 1 }
 0x396   :  { %1733 = vsyncpa [#allocation10 + $0x1], 1 }
 0x397   :  { %1734 = vsyncpa [#allocation13], 1 }
 0x398   :  { %1735 = vsyncpa [#allocation16], 1 }
 0x399   :  { %1736 = vsyncpa [#allocation11], 1 }
 0x39a   :  { %1738 = vsyncpa [#allocation11 + $0x1], 1 }

</bundles_post_ra>
